<compile_context>
chip_gen: v7x
topology: tpu7x:2x2x1
jax: 0.10.0
libtpu: 0.0.40
codegen_flags: <defaults>
</compile_context>

<pallas_src>
import functools

import jax
import jax.numpy as jnp
from jax.experimental import pallas as pl
from jax.experimental.pallas import tpu as pltpu


def _resblock_kernel(x_ref, w1_ref, b1_ref, wa1_ref, ba1_ref, wa2_ref, ba2_ref,
                     w2_ref, mask_ref, pool_ref, bcast_ref, o_ref,
                     patch1_ref, patch2_ref, *,
                     W, in_scale, out_scale, mm_dtype):
    """One batch-tile per grid step. Channels on sublanes, B_tile*H*W on lanes."""
    Ltot = x_ref.shape[1]                                  # B_tile * H * W

    x = x_ref[...]                                         # (Cin, Ltot) float32

    # Hoisted 3x3 border masks (tap-major, per-image coordinates).  Loaded once
    # and reused by BOTH im2col builds — no duplicated iota/compare chains.
    mask_rows = [mask_ref[t:t + 1, :] for t in range(9)]   # each (1, Ltot), mm_dtype

    def build_patch(v, patch_ref):
        """Stage the (9*C, Ltot) im2col patch of v into VMEM scratch.

        Spatial shifts ride the XLU (pltpu.roll over the flattened lane axis);
        image-border and cross-image wrap-around taps are zeroed by the
        precomputed per-image masks, so no zero-padded buffers are needed and
        nothing leaks between adjacent images sharing the lane axis.
        """
        C = v.shape[0]
        t = 0
        for dy in (-1, 0, 1):
            for dx in (-1, 0, 1):
                s = dy * W + dx                            # flat in-image shift
                shifted = v if s == 0 else pltpu.roll(v, shift=(-s) % Ltot, axis=1)
                patch_ref[t * C:(t + 1) * C, :] = shifted * mask_rows[t]
                t += 1

    # ---- conv1: 3x3, pad=1, bias=True — ONE im2col matmul (K = 9*Cin) -------
    y = (x * in_scale).astype(mm_dtype)                    # cast BEFORE im2col
    build_patch(y, patch1_ref)
    h = jnp.dot(w1_ref[...], patch1_ref[...], preferred_element_type=jnp.float32)
    h = jnp.maximum(h + b1_ref[...], 0.0)                  # (Cmid, Ltot) f32

    # ---- AttentionBlock (squeeze-excite gate) --------------------------------
    # For H, W <= 16: AvgPool2d(31, s=16, p=15, count_include_pad=False) +
    # nearest Upsample(16) + crop == per-image global mean broadcast.
    # Segment pooling / broadcast are matmuls against constant 0/1 matrices, so
    # the 1x1 convs see N = B_tile lanes and the sigmoid only touches
    # (Cmid, B_tile) elements (attention path kept in f32 for accuracy).
    pooled = jnp.dot(h, pool_ref[...], preferred_element_type=jnp.float32)   # (Cmid, B)
    a = jnp.dot(wa1_ref[...], pooled,
                preferred_element_type=jnp.float32) + ba1_ref[...]           # (Cred, B)
    a = jnp.maximum(a, 0.0)
    g = jnp.dot(wa2_ref[...], a,
                preferred_element_type=jnp.float32) + ba2_ref[...]           # (Cmid, B)
    g = 1.0 / (1.0 + jnp.exp(-g))       # exact sigmoid; only Cmid*B_tile elements
    gate = jnp.dot(g, bcast_ref[...], preferred_element_type=jnp.float32)    # (Cmid, Ltot)
    h = h * gate

    # ---- conv2: 3x3, pad=1, no bias — ONE im2col matmul (K = 9*Cmid) --------
    build_patch(h.astype(mm_dtype), patch2_ref)
    r = jnp.dot(w2_ref[...], patch2_ref[...], preferred_element_type=jnp.float32)

    o_ref[...] = (r * (2.0 * out_scale) + x).astype(o_ref.dtype)


def _choose_b_tile(n, c_in, c_mid, l_img, itemsize, vmem_budget=20 << 20):
    """Largest divisor of n that fits the VMEM budget and keeps >= 2 grid steps
    (so v7x megacore still gets both TensorCores)."""
    best = 1
    for t in range(1, n + 1):
        if n % t:
            continue
        ltot = t * l_img
        foot = (4 * c_in * ltot * 4                        # dbl-buffered x + out
                + 9 * (c_in + c_mid) * ltot * itemsize     # im2col scratch
                + 2 * 9 * ltot * itemsize                  # masks
                + 2 * 4 * ltot * t * 4)                    # pool + bcast matrices
        if foot > vmem_budget:
            continue
        if n // t >= 2 or n == 1:
            best = t
    return best


def resblock_forward(x_nchw, params, *, in_scale, out_scale,
                     mm_dtype=jnp.float32, b_tile=None):
    """PyTorch-equivalent entry point: input/output are NCHW.

    mm_dtype=jnp.bfloat16 selects bf16 matmul/im2col data with f32 accumulation
    (v6e/v7x fast path); default float32 is bit-accurate vs. the reference and
    is the recommended setting on v5e (no bf16 VALU there).
    """
    w1, b1, wa1, ba1, wa2, ba2, w2 = params                # conv weights in HWIO
    N, Cin, H, W = x_nchw.shape
    Cmid = w1.shape[-1]
    Cred = wa1.shape[-1]
    # TODO(synk): kernel assumes H, W <= 16 (== attention stride) so the local
    # AvgPool collapses to the per-image global mean; larger spatial sizes need
    # a tiled overlapping-window pooling pass.
    assert H <= 16 and W <= 16
    L = H * W
    itemsize = int(jnp.dtype(mm_dtype).itemsize)

    if b_tile is None:
        b_tile = _choose_b_tile(N, Cin, Cmid, L, itemsize)
    assert N % b_tile == 0
    G = N // b_tile                                        # grid steps
    Ltot = b_tile * L

    # Lay the input out as (grid, Cin, B_tile*L): batch flattened onto lanes so
    # the kernel is purely 2-D, its conv matmuls are N = B_tile*L wide and the
    # final store is lane-dense.  This is a tiny one-off HBM transpose in XLA.
    x = (x_nchw.reshape(G, b_tile, Cin, L)
               .transpose(0, 2, 1, 3)
               .reshape(G, Cin, Ltot)
               .astype(jnp.float32))

    # im2col weight layouts (tap-major / channel-minor contraction axis) and
    # column-vector biases — tiny one-off glue on the parameters.
    w1_mat = jnp.transpose(w1.reshape(9 * Cin, Cmid)).astype(mm_dtype)   # (Cmid, 9*Cin)
    w2_mat = jnp.transpose(w2.reshape(9 * Cmid, Cin)).astype(mm_dtype)   # (Cin, 9*Cmid)
    b1_c = b1.reshape(Cmid, 1).astype(jnp.float32)
    wa1_t = jnp.transpose(wa1).astype(jnp.float32)                       # (Cred, Cmid)
    ba1_c = ba1.reshape(Cred, 1).astype(jnp.float32)
    wa2_t = jnp.transpose(wa2).astype(jnp.float32)                       # (Cmid, Cred)
    ba2_c = ba2.reshape(Cmid, 1).astype(jnp.float32)

    # Precomputed, batch-aware im2col border masks (per-image coordinates so
    # roll wrap-around cannot leak pixels between images), plus the per-image
    # segment-pooling and nearest-broadcast matrices.
    q = jnp.arange(Ltot, dtype=jnp.int32)
    ql = q % L
    row, col = ql // W, ql % W
    masks = []
    for dy in (-1, 0, 1):
        for dx in (-1, 0, 1):
            ok = ((row + dy >= 0) & (row + dy < H)
                  & (col + dx >= 0) & (col + dx < W))
            masks.append(ok)
    mask_mat = jnp.stack(masks).astype(mm_dtype)                         # (9, Ltot)
    seg = (q // L)[:, None] == jnp.arange(b_tile, dtype=jnp.int32)[None, :]
    pool_mat = seg.astype(jnp.float32) / float(L)                        # (Ltot, B)
    bcast_mat = jnp.transpose(seg).astype(jnp.float32)                   # (B, Ltot)

    kernel = functools.partial(_resblock_kernel, W=W,
                               in_scale=float(in_scale),
                               out_scale=float(out_scale),
                               mm_dtype=mm_dtype)

    def const(shape):
        # Whole-array block, constant across the batch grid (fetched once).
        return pl.BlockSpec(shape, lambda n: (0,) * len(shape))

    # VMEM budget derived from the actual footprint (double-buffered x/out
    # blocks, im2col scratch, constant inputs), sized against v7x's 64 MiB
    # physical VMEM rather than a hard-coded value.
    footprint = (4 * Cin * Ltot * 4
                 + 9 * (Cin + Cmid) * Ltot * itemsize
                 + 2 * 9 * Ltot * itemsize
                 + 2 * 4 * Ltot * b_tile
                 + 2 * (w1_mat.size + w2_mat.size) * itemsize
                 + (1 << 20))
    vmem_limit = int(min(56 << 20, max(8 << 20, 2 * footprint)))

    flops_per_step = 2 * Ltot * (Cmid * 9 * Cin + Cin * 9 * Cmid
                                 + 2 * Cmid * b_tile) \
        + 2 * b_tile * (Cred * Cmid + Cmid * Cred)
    cost = pl.CostEstimate(
        flops=int(G * flops_per_step),
        transcendentals=int(N * Cmid),
        bytes_accessed=int(2 * N * Cin * L * 4
                           + (w1_mat.size + w2_mat.size) * itemsize
                           + mask_mat.size * itemsize
                           + (pool_mat.size + bcast_mat.size) * 4),
    )

    out = pl.pallas_call(
        kernel,
        out_shape=jax.ShapeDtypeStruct((G, Cin, Ltot), jnp.float32),
        grid=(G,),
        in_specs=[
            pl.BlockSpec((None, Cin, Ltot), lambda n: (n, 0, 0)),   # x batch-tile
            const((Cmid, 9 * Cin)),                                 # conv1 weight
            const((Cmid, 1)),                                       # conv1 bias
            const((Cred, Cmid)), const((Cred, 1)),                  # attn 1x1 #1
            const((Cmid, Cred)), const((Cmid, 1)),                  # attn 1x1 #2
            const((Cin, 9 * Cmid)),                                 # conv2 weight
            const((9, Ltot)),                                       # border masks
            const((Ltot, b_tile)),                                  # segment pooling
            const((b_tile, Ltot)),                                  # segment broadcast
        ],
        out_specs=pl.BlockSpec((None, Cin, Ltot), lambda n: (n, 0, 0)),
        scratch_shapes=[pltpu.VMEM((9 * Cin, Ltot), mm_dtype),      # conv1 patch
                        pltpu.VMEM((9 * Cmid, Ltot), mm_dtype)],    # conv2 patch
        compiler_params=pltpu.CompilerParams(
            dimension_semantics=("parallel",),       # megacore split on v7x
            vmem_limit_bytes=vmem_limit,
        ),
        cost_estimate=cost,
    )(x, w1_mat, b1_c, wa1_t, ba1_c, wa2_t, ba2_c, w2_mat,
      mask_mat, pool_mat, bcast_mat)

    return (out.reshape(G, Cin, b_tile, L)
               .transpose(0, 2, 1, 3)
               .reshape(N, Cin, H, W)
               .astype(x_nchw.dtype))


def resblock_reference(x_nchw, params, *, in_scale, out_scale):
    """Pure-JAX reference (same math as the PyTorch module for H, W <= 16)."""
    w1, b1, wa1, ba1, wa2, ba2, w2 = params
    x = jnp.transpose(x_nchw, (0, 2, 3, 1))
    dn = ('NHWC', 'HWIO', 'NHWC')
    y = x * in_scale
    h = jax.lax.conv_general_dilated(y, w1, (1, 1), 'SAME', dimension_numbers=dn)
    h = jax.nn.relu(h + b1.reshape(1, 1, 1, -1))
    pooled = jnp.mean(h, axis=(1, 2))
    a = jax.nn.relu(pooled @ wa1 + ba1)
    a = jax.nn.sigmoid(a @ wa2 + ba2)
    h = h * a[:, None, None, :]
    r = jax.lax.conv_general_dilated(h, w2, (1, 1), 'SAME', dimension_numbers=dn)
    out = r * (2.0 * out_scale) + x
    return jnp.transpose(out, (0, 3, 1, 2))


if __name__ == "__main__":
    n_feats, mid_feats, reduction = 8, 8, 4
    N, H, W = 8, 16, 16                 # N=8 -> b_tile=4, grid=2 (megacore-friendly)
    in_scale, out_scale = 0.5, 0.8

    key = jax.random.PRNGKey(0)
    ks = jax.random.split(key, 8)
    cred = mid_feats // reduction

    # Deterministic synthetic parameters (kaiming-normal-style std for 3x3 convs).
    w1 = jax.random.normal(ks[0], (3, 3, n_feats, mid_feats), jnp.float32) \
        * (2.0 / (9 * n_feats)) ** 0.5
    b1 = jnp.zeros((mid_feats,), jnp.float32)                    # nn.init.zeros_
    wa1 = jax.random.normal(ks[1], (mid_feats, cred), jnp.float32) \
        * (1.0 / mid_feats) ** 0.5
    ba1 = jax.random.normal(ks[2], (cred,), jnp.float32) * 0.05
    wa2 = jax.random.normal(ks[3], (cred, mid_feats), jnp.float32) \
        * (1.0 / cred) ** 0.5
    ba2 = jax.random.normal(ks[4], (mid_feats,), jnp.float32) * 0.05
    w2 = jax.random.normal(ks[5], (3, 3, mid_feats, n_feats), jnp.float32) \
        * (2.0 / (9 * mid_feats)) ** 0.5
    params = (w1, b1, wa1, ba1, wa2, ba2, w2)

    x = jax.random.normal(ks[6], (N, n_feats, H, W), jnp.float32)   # NCHW like PyTorch

    ref = resblock_reference(x, params, in_scale=in_scale, out_scale=out_scale)

    # --- default f32 path: strict check (also validates cross-image masking) --
    out = resblock_forward(x, params, in_scale=in_scale, out_scale=out_scale)
    out = jax.block_until_ready(out)
    assert out.shape == x.shape
    max_err = float(jnp.max(jnp.abs(out - ref)))
    assert jnp.allclose(out, ref, atol=5e-4, rtol=5e-4), max_err

    # --- bf16 path (v6e/v7x fast path, cast before im2col): loose check -------
    out_bf16 = jax.block_until_ready(
        resblock_forward(x, params, in_scale=in_scale, out_scale=out_scale,
                         mm_dtype=jnp.bfloat16))
    max_err_bf16 = float(jnp.max(jnp.abs(out_bf16 - ref)))
    assert jnp.allclose(out_bf16, ref, atol=1e-1, rtol=1e-1), max_err_bf16

    print("KERNEL_OK")
</pallas_src>

<mosaic_0001>
module attributes {stable_mosaic.version = 11 : i64} {
  func.func @_resblock_kernel(%arg0: i32, %arg1: memref<1x8x1024xf32, #tpu.memory_space<vmem>>, %arg2: memref<8x72xf32, #tpu.memory_space<vmem>>, %arg3: memref<8x1xf32, #tpu.memory_space<vmem>>, %arg4: memref<2x8xf32, #tpu.memory_space<vmem>>, %arg5: memref<2x1xf32, #tpu.memory_space<vmem>>, %arg6: memref<8x2xf32, #tpu.memory_space<vmem>>, %arg7: memref<8x1xf32, #tpu.memory_space<vmem>>, %arg8: memref<8x72xf32, #tpu.memory_space<vmem>>, %arg9: memref<9x1024xf32, #tpu.memory_space<vmem>>, %arg10: memref<1024x4xf32, #tpu.memory_space<vmem>>, %arg11: memref<4x1024xf32, #tpu.memory_space<vmem>>, %arg12: memref<1x8x1024xf32, #tpu.memory_space<vmem>>, %arg13: memref<72x1024xf32, #tpu.memory_space<vmem>>, %arg14: memref<72x1024xf32, #tpu.memory_space<vmem>>) attributes {dimension_semantics = [#tpu.dimension_semantics<parallel>], iteration_bounds = array<i64: 2>, scalar_prefetch = 0 : i64, scratch_operands = 2 : i64, tpu.core_type = #tpu.core_type<tc>, window_params = [{transform_indices = @transform_0, window_bounds = array<i64: 1, 8, 1024>}, {pipeline_mode = #tpu.pipeline_mode<synchronous>, transform_indices = @transform_1, window_bounds = array<i64: 8, 72>}, {pipeline_mode = #tpu.pipeline_mode<synchronous>, transform_indices = @transform_2, window_bounds = array<i64: 8, 1>}, {pipeline_mode = #tpu.pipeline_mode<synchronous>, transform_indices = @transform_3, window_bounds = array<i64: 2, 8>}, {pipeline_mode = #tpu.pipeline_mode<synchronous>, transform_indices = @transform_4, window_bounds = array<i64: 2, 1>}, {pipeline_mode = #tpu.pipeline_mode<synchronous>, transform_indices = @transform_5, window_bounds = array<i64: 8, 2>}, {pipeline_mode = #tpu.pipeline_mode<synchronous>, transform_indices = @transform_6, window_bounds = array<i64: 8, 1>}, {pipeline_mode = #tpu.pipeline_mode<synchronous>, transform_indices = @transform_7, window_bounds = array<i64: 8, 72>}, {pipeline_mode = #tpu.pipeline_mode<synchronous>, transform_indices = @transform_8, window_bounds = array<i64: 9, 1024>}, {pipeline_mode = #tpu.pipeline_mode<synchronous>, transform_indices = @transform_9, window_bounds = array<i64: 1024, 4>}, {pipeline_mode = #tpu.pipeline_mode<synchronous>, transform_indices = @transform_10, window_bounds = array<i64: 4, 1024>}, {transform_indices = @transform_11, window_bounds = array<i64: 1, 8, 1024>}]} {
    %c0 = arith.constant 0 : index
    %c0_0 = arith.constant 0 : index
    %c0_1 = arith.constant 0 : index
    %0 = vector.load %arg1[%c0, %c0_0, %c0_1] : memref<1x8x1024xf32, #tpu.memory_space<vmem>>, vector<1x8x1024xf32>
    %1 = vector.shape_cast %0 : vector<1x8x1024xf32> to vector<8x1024xf32>
    %c0_2 = arith.constant 0 : index
    %c0_3 = arith.constant 0 : index
    %2 = vector.load %arg9[%c0_2, %c0_3] : memref<9x1024xf32, #tpu.memory_space<vmem>>, vector<1x1024xf32>
    %c1 = arith.constant 1 : index
    %c0_4 = arith.constant 0 : index
    %3 = vector.load %arg9[%c1, %c0_4] : memref<9x1024xf32, #tpu.memory_space<vmem>>, vector<1x1024xf32>
    %c2 = arith.constant 2 : index
    %c0_5 = arith.constant 0 : index
    %4 = vector.load %arg9[%c2, %c0_5] : memref<9x1024xf32, #tpu.memory_space<vmem>>, vector<1x1024xf32>
    %c3 = arith.constant 3 : index
    %c0_6 = arith.constant 0 : index
    %5 = vector.load %arg9[%c3, %c0_6] : memref<9x1024xf32, #tpu.memory_space<vmem>>, vector<1x1024xf32>
    %c4 = arith.constant 4 : index
    %c0_7 = arith.constant 0 : index
    %6 = vector.load %arg9[%c4, %c0_7] : memref<9x1024xf32, #tpu.memory_space<vmem>>, vector<1x1024xf32>
    %c5 = arith.constant 5 : index
    %c0_8 = arith.constant 0 : index
    %7 = vector.load %arg9[%c5, %c0_8] : memref<9x1024xf32, #tpu.memory_space<vmem>>, vector<1x1024xf32>
    %c6 = arith.constant 6 : index
    %c0_9 = arith.constant 0 : index
    %8 = vector.load %arg9[%c6, %c0_9] : memref<9x1024xf32, #tpu.memory_space<vmem>>, vector<1x1024xf32>
    %c7 = arith.constant 7 : index
    %c0_10 = arith.constant 0 : index
    %9 = vector.load %arg9[%c7, %c0_10] : memref<9x1024xf32, #tpu.memory_space<vmem>>, vector<1x1024xf32>
    %c8 = arith.constant 8 : index
    %c0_11 = arith.constant 0 : index
    %10 = vector.load %arg9[%c8, %c0_11] : memref<9x1024xf32, #tpu.memory_space<vmem>>, vector<1x1024xf32>
    %cst = arith.constant 5.000000e-01 : f32
    %11 = vector.broadcast %cst : f32 to vector<8x1024xf32>
    %12 = arith.mulf %1, %11 : vector<8x1024xf32>
    %c17_i32 = arith.constant 17 : i32
    %13 = tpu.dynamic_rotate %12 by %c17_i32 dim 1 : vector<8x1024xf32>, i32 -> vector<8x1024xf32>
    %14 = vector.broadcast %2 : vector<1x1024xf32> to vector<8x1024xf32>
    %15 = arith.mulf %13, %14 : vector<8x1024xf32>
    %c0_12 = arith.constant 0 : index
    %c0_13 = arith.constant 0 : index
    %16 = vector.load %arg13[%c0_12, %c0_13] : memref<72x1024xf32, #tpu.memory_space<vmem>>, vector<8x1024xf32>
    tpu.vector_store %arg13[%c0_12, %c0_13], %15 {strides = array<i32>} : memref<72x1024xf32, #tpu.memory_space<vmem>>, vector<8x1024xf32>,
    %c16_i32 = arith.constant 16 : i32
    %17 = tpu.dynamic_rotate %12 by %c16_i32 dim 1 : vector<8x1024xf32>, i32 -> vector<8x1024xf32>
    %18 = vector.broadcast %3 : vector<1x1024xf32> to vector<8x1024xf32>
    %19 = arith.mulf %17, %18 : vector<8x1024xf32>
    %c8_14 = arith.constant 8 : index
    %c0_15 = arith.constant 0 : index
    %20 = vector.load %arg13[%c8_14, %c0_15] : memref<72x1024xf32, #tpu.memory_space<vmem>>, vector<8x1024xf32>
    tpu.vector_store %arg13[%c8_14, %c0_15], %19 {strides = array<i32>} : memref<72x1024xf32, #tpu.memory_space<vmem>>, vector<8x1024xf32>,
    %c15_i32 = arith.constant 15 : i32
    %21 = tpu.dynamic_rotate %12 by %c15_i32 dim 1 : vector<8x1024xf32>, i32 -> vector<8x1024xf32>
    %22 = vector.broadcast %4 : vector<1x1024xf32> to vector<8x1024xf32>
    %23 = arith.mulf %21, %22 : vector<8x1024xf32>
    %c16 = arith.constant 16 : index
    %c0_16 = arith.constant 0 : index
    %24 = vector.load %arg13[%c16, %c0_16] : memref<72x1024xf32, #tpu.memory_space<vmem>>, vector<8x1024xf32>
    tpu.vector_store %arg13[%c16, %c0_16], %23 {strides = array<i32>} : memref<72x1024xf32, #tpu.memory_space<vmem>>, vector<8x1024xf32>,
    %c1_i32 = arith.constant 1 : i32
    %25 = tpu.dynamic_rotate %12 by %c1_i32 dim 1 : vector<8x1024xf32>, i32 -> vector<8x1024xf32>
    %26 = vector.broadcast %5 : vector<1x1024xf32> to vector<8x1024xf32>
    %27 = arith.mulf %25, %26 : vector<8x1024xf32>
    %c24 = arith.constant 24 : index
    %c0_17 = arith.constant 0 : index
    %28 = vector.load %arg13[%c24, %c0_17] : memref<72x1024xf32, #tpu.memory_space<vmem>>, vector<8x1024xf32>
    tpu.vector_store %arg13[%c24, %c0_17], %27 {strides = array<i32>} : memref<72x1024xf32, #tpu.memory_space<vmem>>, vector<8x1024xf32>,
    %29 = vector.broadcast %6 : vector<1x1024xf32> to vector<8x1024xf32>
    %30 = arith.mulf %12, %29 : vector<8x1024xf32>
    %c32 = arith.constant 32 : index
    %c0_18 = arith.constant 0 : index
    %31 = vector.load %arg13[%c32, %c0_18] : memref<72x1024xf32, #tpu.memory_space<vmem>>, vector<8x1024xf32>
    tpu.vector_store %arg13[%c32, %c0_18], %30 {strides = array<i32>} : memref<72x1024xf32, #tpu.memory_space<vmem>>, vector<8x1024xf32>,
    %c1023_i32 = arith.constant 1023 : i32
    %32 = tpu.dynamic_rotate %12 by %c1023_i32 dim 1 : vector<8x1024xf32>, i32 -> vector<8x1024xf32>
    %33 = vector.broadcast %7 : vector<1x1024xf32> to vector<8x1024xf32>
    %34 = arith.mulf %32, %33 : vector<8x1024xf32>
    %c40 = arith.constant 40 : index
    %c0_19 = arith.constant 0 : index
    %35 = vector.load %arg13[%c40, %c0_19] : memref<72x1024xf32, #tpu.memory_space<vmem>>, vector<8x1024xf32>
    tpu.vector_store %arg13[%c40, %c0_19], %34 {strides = array<i32>} : memref<72x1024xf32, #tpu.memory_space<vmem>>, vector<8x1024xf32>,
    %c1009_i32 = arith.constant 1009 : i32
    %36 = tpu.dynamic_rotate %12 by %c1009_i32 dim 1 : vector<8x1024xf32>, i32 -> vector<8x1024xf32>
    %37 = vector.broadcast %8 : vector<1x1024xf32> to vector<8x1024xf32>
    %38 = arith.mulf %36, %37 : vector<8x1024xf32>
    %c48 = arith.constant 48 : index
    %c0_20 = arith.constant 0 : index
    %39 = vector.load %arg13[%c48, %c0_20] : memref<72x1024xf32, #tpu.memory_space<vmem>>, vector<8x1024xf32>
    tpu.vector_store %arg13[%c48, %c0_20], %38 {strides = array<i32>} : memref<72x1024xf32, #tpu.memory_space<vmem>>, vector<8x1024xf32>,
    %c1008_i32 = arith.constant 1008 : i32
    %40 = tpu.dynamic_rotate %12 by %c1008_i32 dim 1 : vector<8x1024xf32>, i32 -> vector<8x1024xf32>
    %41 = vector.broadcast %9 : vector<1x1024xf32> to vector<8x1024xf32>
    %42 = arith.mulf %40, %41 : vector<8x1024xf32>
    %c56 = arith.constant 56 : index
    %c0_21 = arith.constant 0 : index
    %43 = vector.load %arg13[%c56, %c0_21] : memref<72x1024xf32, #tpu.memory_space<vmem>>, vector<8x1024xf32>
    tpu.vector_store %arg13[%c56, %c0_21], %42 {strides = array<i32>} : memref<72x1024xf32, #tpu.memory_space<vmem>>, vector<8x1024xf32>,
    %c1007_i32 = arith.constant 1007 : i32
    %44 = tpu.dynamic_rotate %12 by %c1007_i32 dim 1 : vector<8x1024xf32>, i32 -> vector<8x1024xf32>
    %45 = vector.broadcast %10 : vector<1x1024xf32> to vector<8x1024xf32>
    %46 = arith.mulf %44, %45 : vector<8x1024xf32>
    %c64 = arith.constant 64 : index
    %c0_22 = arith.constant 0 : index
    %47 = vector.load %arg13[%c64, %c0_22] : memref<72x1024xf32, #tpu.memory_space<vmem>>, vector<8x1024xf32>
    tpu.vector_store %arg13[%c64, %c0_22], %46 {strides = array<i32>} : memref<72x1024xf32, #tpu.memory_space<vmem>>, vector<8x1024xf32>,
    %c0_23 = arith.constant 0 : index
    %c0_24 = arith.constant 0 : index
    %48 = vector.load %arg2[%c0_23, %c0_24] : memref<8x72xf32, #tpu.memory_space<vmem>>, vector<8x72xf32>
    %c0_25 = arith.constant 0 : index
    %c0_26 = arith.constant 0 : index
    %49 = vector.load %arg13[%c0_25, %c0_26] : memref<72x1024xf32, #tpu.memory_space<vmem>>, vector<72x1024xf32>
    %cst_27 = arith.constant dense<0.000000e+00> : vector<8x1024xf32>
    %50 = tpu.matmul %48, %49, %cst_27 {dimension_numbers = #tpu.dot_dimension_numbers<[1], [0], [0], [1], [0, 0, 1, 1], [], []>} : vector<8x72xf32>, vector<72x1024xf32>, vector<8x1024xf32> -> vector<8x1024xf32>
    %c0_28 = arith.constant 0 : index
    %c0_29 = arith.constant 0 : index
    %51 = vector.load %arg3[%c0_28, %c0_29] : memref<8x1xf32, #tpu.memory_space<vmem>>, vector<8x1xf32>
    %52 = vector.broadcast %51 : vector<8x1xf32> to vector<8x1024xf32>
    %53 = arith.addf %50, %52 : vector<8x1024xf32>
    %cst_30 = arith.constant 0.000000e+00 : f32
    %54 = vector.broadcast %cst_30 : f32 to vector<8x1024xf32>
    %55 = arith.maximumf %53, %54 : vector<8x1024xf32>
    %c0_31 = arith.constant 0 : index
    %c0_32 = arith.constant 0 : index
    %56 = vector.load %arg10[%c0_31, %c0_32] : memref<1024x4xf32, #tpu.memory_space<vmem>>, vector<1024x4xf32>
    %cst_33 = arith.constant dense<0.000000e+00> : vector<8x4xf32>
    %57 = tpu.matmul %55, %56, %cst_33 {dimension_numbers = #tpu.dot_dimension_numbers<[1], [0], [0], [1], [0, 0, 1, 1], [], []>} : vector<8x1024xf32>, vector<1024x4xf32>, vector<8x4xf32> -> vector<8x4xf32>
    %c0_34 = arith.constant 0 : index
    %c0_35 = arith.constant 0 : index
    %58 = vector.load %arg4[%c0_34, %c0_35] : memref<2x8xf32, #tpu.memory_space<vmem>>, vector<2x8xf32>
    %cst_36 = arith.constant dense<0.000000e+00> : vector<2x4xf32>
    %59 = tpu.matmul %58, %57, %cst_36 {dimension_numbers = #tpu.dot_dimension_numbers<[1], [0], [0], [1], [0, 0, 1, 1], [], []>} : vector<2x8xf32>, vector<8x4xf32>, vector<2x4xf32> -> vector<2x4xf32>
    %c0_37 = arith.constant 0 : index
    %c0_38 = arith.constant 0 : index
    %60 = vector.load %arg5[%c0_37, %c0_38] : memref<2x1xf32, #tpu.memory_space<vmem>>, vector<2x1xf32>
    %61 = vector.broadcast %60 : vector<2x1xf32> to vector<2x4xf32>
    %62 = arith.addf %59, %61 : vector<2x4xf32>
    %cst_39 = arith.constant 0.000000e+00 : f32
    %63 = vector.broadcast %cst_39 : f32 to vector<2x4xf32>
    %64 = arith.maximumf %62, %63 : vector<2x4xf32>
    %c0_40 = arith.constant 0 : index
    %c0_41 = arith.constant 0 : index
    %65 = vector.load %arg6[%c0_40, %c0_41] : memref<8x2xf32, #tpu.memory_space<vmem>>, vector<8x2xf32>
    %cst_42 = arith.constant dense<0.000000e+00> : vector<8x4xf32>
    %66 = tpu.matmul %65, %64, %cst_42 {dimension_numbers = #tpu.dot_dimension_numbers<[1], [0], [0], [1], [0, 0, 1, 1], [], []>} : vector<8x2xf32>, vector<2x4xf32>, vector<8x4xf32> -> vector<8x4xf32>
    %c0_43 = arith.constant 0 : index
    %c0_44 = arith.constant 0 : index
    %67 = vector.load %arg7[%c0_43, %c0_44] : memref<8x1xf32, #tpu.memory_space<vmem>>, vector<8x1xf32>
    %68 = vector.broadcast %67 : vector<8x1xf32> to vector<8x4xf32>
    %69 = arith.addf %66, %68 : vector<8x4xf32>
    %cst_45 = arith.constant 0.000000e+00 : f32
    %70 = vector.broadcast %cst_45 : f32 to vector<8x4xf32>
    %71 = arith.subf %70, %69 : vector<8x4xf32>
    %72 = math.exp %71 : vector<8x4xf32>
    %cst_46 = arith.constant 1.000000e+00 : f32
    %73 = vector.broadcast %cst_46 : f32 to vector<8x4xf32>
    %74 = arith.addf %73, %72 : vector<8x4xf32>
    %cst_47 = arith.constant 1.000000e+00 : f32
    %75 = vector.broadcast %cst_47 : f32 to vector<8x4xf32>
    %76 = arith.divf %75, %74 : vector<8x4xf32>
    %c0_48 = arith.constant 0 : index
    %c0_49 = arith.constant 0 : index
    %77 = vector.load %arg11[%c0_48, %c0_49] : memref<4x1024xf32, #tpu.memory_space<vmem>>, vector<4x1024xf32>
    %cst_50 = arith.constant dense<0.000000e+00> : vector<8x1024xf32>
    %78 = tpu.matmul %76, %77, %cst_50 {dimension_numbers = #tpu.dot_dimension_numbers<[1], [0], [0], [1], [0, 0, 1, 1], [], []>} : vector<8x4xf32>, vector<4x1024xf32>, vector<8x1024xf32> -> vector<8x1024xf32>
    %79 = arith.mulf %55, %78 : vector<8x1024xf32>
    %c17_i32_51 = arith.constant 17 : i32
    %80 = tpu.dynamic_rotate %79 by %c17_i32_51 dim 1 : vector<8x1024xf32>, i32 -> vector<8x1024xf32>
    %81 = vector.broadcast %2 : vector<1x1024xf32> to vector<8x1024xf32>
    %82 = arith.mulf %80, %81 : vector<8x1024xf32>
    %c0_52 = arith.constant 0 : index
    %c0_53 = arith.constant 0 : index
    %83 = vector.load %arg14[%c0_52, %c0_53] : memref<72x1024xf32, #tpu.memory_space<vmem>>, vector<8x1024xf32>
    tpu.vector_store %arg14[%c0_52, %c0_53], %82 {strides = array<i32>} : memref<72x1024xf32, #tpu.memory_space<vmem>>, vector<8x1024xf32>,
    %c16_i32_54 = arith.constant 16 : i32
    %84 = tpu.dynamic_rotate %79 by %c16_i32_54 dim 1 : vector<8x1024xf32>, i32 -> vector<8x1024xf32>
    %85 = vector.broadcast %3 : vector<1x1024xf32> to vector<8x1024xf32>
    %86 = arith.mulf %84, %85 : vector<8x1024xf32>
    %c8_55 = arith.constant 8 : index
    %c0_56 = arith.constant 0 : index
    %87 = vector.load %arg14[%c8_55, %c0_56] : memref<72x1024xf32, #tpu.memory_space<vmem>>, vector<8x1024xf32>
    tpu.vector_store %arg14[%c8_55, %c0_56], %86 {strides = array<i32>} : memref<72x1024xf32, #tpu.memory_space<vmem>>, vector<8x1024xf32>,
    %c15_i32_57 = arith.constant 15 : i32
    %88 = tpu.dynamic_rotate %79 by %c15_i32_57 dim 1 : vector<8x1024xf32>, i32 -> vector<8x1024xf32>
    %89 = vector.broadcast %4 : vector<1x1024xf32> to vector<8x1024xf32>
    %90 = arith.mulf %88, %89 : vector<8x1024xf32>
    %c16_58 = arith.constant 16 : index
    %c0_59 = arith.constant 0 : index
    %91 = vector.load %arg14[%c16_58, %c0_59] : memref<72x1024xf32, #tpu.memory_space<vmem>>, vector<8x1024xf32>
    tpu.vector_store %arg14[%c16_58, %c0_59], %90 {strides = array<i32>} : memref<72x1024xf32, #tpu.memory_space<vmem>>, vector<8x1024xf32>,
    %c1_i32_60 = arith.constant 1 : i32
    %92 = tpu.dynamic_rotate %79 by %c1_i32_60 dim 1 : vector<8x1024xf32>, i32 -> vector<8x1024xf32>
    %93 = vector.broadcast %5 : vector<1x1024xf32> to vector<8x1024xf32>
    %94 = arith.mulf %92, %93 : vector<8x1024xf32>
    %c24_61 = arith.constant 24 : index
    %c0_62 = arith.constant 0 : index
    %95 = vector.load %arg14[%c24_61, %c0_62] : memref<72x1024xf32, #tpu.memory_space<vmem>>, vector<8x1024xf32>
    tpu.vector_store %arg14[%c24_61, %c0_62], %94 {strides = array<i32>} : memref<72x1024xf32, #tpu.memory_space<vmem>>, vector<8x1024xf32>,
    %96 = vector.broadcast %6 : vector<1x1024xf32> to vector<8x1024xf32>
    %97 = arith.mulf %79, %96 : vector<8x1024xf32>
    %c32_63 = arith.constant 32 : index
    %c0_64 = arith.constant 0 : index
    %98 = vector.load %arg14[%c32_63, %c0_64] : memref<72x1024xf32, #tpu.memory_space<vmem>>, vector<8x1024xf32>
    tpu.vector_store %arg14[%c32_63, %c0_64], %97 {strides = array<i32>} : memref<72x1024xf32, #tpu.memory_space<vmem>>, vector<8x1024xf32>,
    %c1023_i32_65 = arith.constant 1023 : i32
    %99 = tpu.dynamic_rotate %79 by %c1023_i32_65 dim 1 : vector<8x1024xf32>, i32 -> vector<8x1024xf32>
    %100 = vector.broadcast %7 : vector<1x1024xf32> to vector<8x1024xf32>
    %101 = arith.mulf %99, %100 : vector<8x1024xf32>
    %c40_66 = arith.constant 40 : index
    %c0_67 = arith.constant 0 : index
    %102 = vector.load %arg14[%c40_66, %c0_67] : memref<72x1024xf32, #tpu.memory_space<vmem>>, vector<8x1024xf32>
    tpu.vector_store %arg14[%c40_66, %c0_67], %101 {strides = array<i32>} : memref<72x1024xf32, #tpu.memory_space<vmem>>, vector<8x1024xf32>,
    %c1009_i32_68 = arith.constant 1009 : i32
    %103 = tpu.dynamic_rotate %79 by %c1009_i32_68 dim 1 : vector<8x1024xf32>, i32 -> vector<8x1024xf32>
    %104 = vector.broadcast %8 : vector<1x1024xf32> to vector<8x1024xf32>
    %105 = arith.mulf %103, %104 : vector<8x1024xf32>
    %c48_69 = arith.constant 48 : index
    %c0_70 = arith.constant 0 : index
    %106 = vector.load %arg14[%c48_69, %c0_70] : memref<72x1024xf32, #tpu.memory_space<vmem>>, vector<8x1024xf32>
    tpu.vector_store %arg14[%c48_69, %c0_70], %105 {strides = array<i32>} : memref<72x1024xf32, #tpu.memory_space<vmem>>, vector<8x1024xf32>,
    %c1008_i32_71 = arith.constant 1008 : i32
    %107 = tpu.dynamic_rotate %79 by %c1008_i32_71 dim 1 : vector<8x1024xf32>, i32 -> vector<8x1024xf32>
    %108 = vector.broadcast %9 : vector<1x1024xf32> to vector<8x1024xf32>
    %109 = arith.mulf %107, %108 : vector<8x1024xf32>
    %c56_72 = arith.constant 56 : index
    %c0_73 = arith.constant 0 : index
    %110 = vector.load %arg14[%c56_72, %c0_73] : memref<72x1024xf32, #tpu.memory_space<vmem>>, vector<8x1024xf32>
    tpu.vector_store %arg14[%c56_72, %c0_73], %109 {strides = array<i32>} : memref<72x1024xf32, #tpu.memory_space<vmem>>, vector<8x1024xf32>,
    %c1007_i32_74 = arith.constant 1007 : i32
    %111 = tpu.dynamic_rotate %79 by %c1007_i32_74 dim 1 : vector<8x1024xf32>, i32 -> vector<8x1024xf32>
    %112 = vector.broadcast %10 : vector<1x1024xf32> to vector<8x1024xf32>
    %113 = arith.mulf %111, %112 : vector<8x1024xf32>
    %c64_75 = arith.constant 64 : index
    %c0_76 = arith.constant 0 : index
    %114 = vector.load %arg14[%c64_75, %c0_76] : memref<72x1024xf32, #tpu.memory_space<vmem>>, vector<8x1024xf32>
    tpu.vector_store %arg14[%c64_75, %c0_76], %113 {strides = array<i32>} : memref<72x1024xf32, #tpu.memory_space<vmem>>, vector<8x1024xf32>,
    %c0_77 = arith.constant 0 : index
    %c0_78 = arith.constant 0 : index
    %115 = vector.load %arg8[%c0_77, %c0_78] : memref<8x72xf32, #tpu.memory_space<vmem>>, vector<8x72xf32>
    %c0_79 = arith.constant 0 : index
    %c0_80 = arith.constant 0 : index
    %116 = vector.load %arg14[%c0_79, %c0_80] : memref<72x1024xf32, #tpu.memory_space<vmem>>, vector<72x1024xf32>
    %cst_81 = arith.constant dense<0.000000e+00> : vector<8x1024xf32>
    %117 = tpu.matmul %115, %116, %cst_81 {dimension_numbers = #tpu.dot_dimension_numbers<[1], [0], [0], [1], [0, 0, 1, 1], [], []>} : vector<8x72xf32>, vector<72x1024xf32>, vector<8x1024xf32> -> vector<8x1024xf32>
    %cst_82 = arith.constant 1.600000e+00 : f32
    %118 = vector.broadcast %cst_82 : f32 to vector<8x1024xf32>
    %119 = arith.mulf %117, %118 : vector<8x1024xf32>
    %120 = arith.addf %119, %1 : vector<8x1024xf32>
    %c0_83 = arith.constant 0 : index
    %c0_84 = arith.constant 0 : index
    %c0_85 = arith.constant 0 : index
    %121 = vector.load %arg12[%c0_83, %c0_84, %c0_85] : memref<1x8x1024xf32, #tpu.memory_space<vmem>>, vector<1x8x1024xf32>
    %122 = vector.shape_cast %121 : vector<1x8x1024xf32> to vector<8x1024xf32>
    %123 = vector.shape_cast %120 : vector<8x1024xf32> to vector<1x8x1024xf32>
    tpu.vector_store %arg12[%c0_83, %c0_84, %c0_85], %123 {strides = array<i32>} : memref<1x8x1024xf32, #tpu.memory_space<vmem>>, vector<1x8x1024xf32>,
    return
  }
  func.func @transform_0(%arg0: i32) -> (i32, i32, i32) {
    %c0_i32 = arith.constant 0 : i32
    %c0_i32_0 = arith.constant 0 : i32
    %c0_i32_1 = arith.constant 0 : i32
    return %arg0, %c0_i32, %c0_i32_0 : i32, i32, i32
  }
  func.func @transform_1(%arg0: i32) -> (i32, i32) {
    %c0_i32 = arith.constant 0 : i32
    %c0_i32_0 = arith.constant 0 : i32
    %c0_i32_1 = arith.constant 0 : i32
    return %c0_i32, %c0_i32_0 : i32, i32
  }
  func.func @transform_2(%arg0: i32) -> (i32, i32) {
    %c0_i32 = arith.constant 0 : i32
    %c0_i32_0 = arith.constant 0 : i32
    %c0_i32_1 = arith.constant 0 : i32
    return %c0_i32, %c0_i32_0 : i32, i32
  }
  func.func @transform_3(%arg0: i32) -> (i32, i32) {
    %c0_i32 = arith.constant 0 : i32
    %c0_i32_0 = arith.constant 0 : i32
    %c0_i32_1 = arith.constant 0 : i32
    return %c0_i32, %c0_i32_0 : i32, i32
  }
  func.func @transform_4(%arg0: i32) -> (i32, i32) {
    %c0_i32 = arith.constant 0 : i32
    %c0_i32_0 = arith.constant 0 : i32
    %c0_i32_1 = arith.constant 0 : i32
    return %c0_i32, %c0_i32_0 : i32, i32
  }
  func.func @transform_5(%arg0: i32) -> (i32, i32) {
    %c0_i32 = arith.constant 0 : i32
    %c0_i32_0 = arith.constant 0 : i32
    %c0_i32_1 = arith.constant 0 : i32
    return %c0_i32, %c0_i32_0 : i32, i32
  }
  func.func @transform_6(%arg0: i32) -> (i32, i32) {
    %c0_i32 = arith.constant 0 : i32
    %c0_i32_0 = arith.constant 0 : i32
    %c0_i32_1 = arith.constant 0 : i32
    return %c0_i32, %c0_i32_0 : i32, i32
  }
  func.func @transform_7(%arg0: i32) -> (i32, i32) {
    %c0_i32 = arith.constant 0 : i32
    %c0_i32_0 = arith.constant 0 : i32
    %c0_i32_1 = arith.constant 0 : i32
    return %c0_i32, %c0_i32_0 : i32, i32
  }
  func.func @transform_8(%arg0: i32) -> (i32, i32) {
    %c0_i32 = arith.constant 0 : i32
    %c0_i32_0 = arith.constant 0 : i32
    %c0_i32_1 = arith.constant 0 : i32
    return %c0_i32, %c0_i32_0 : i32, i32
  }
  func.func @transform_9(%arg0: i32) -> (i32, i32) {
    %c0_i32 = arith.constant 0 : i32
    %c0_i32_0 = arith.constant 0 : i32
    %c0_i32_1 = arith.constant 0 : i32
    return %c0_i32, %c0_i32_0 : i32, i32
  }
  func.func @transform_10(%arg0: i32) -> (i32, i32) {
    %c0_i32 = arith.constant 0 : i32
    %c0_i32_0 = arith.constant 0 : i32
    %c0_i32_1 = arith.constant 0 : i32
    return %c0_i32, %c0_i32_0 : i32, i32
  }
  func.func @transform_11(%arg0: i32) -> (i32, i32, i32) {
    %c0_i32 = arith.constant 0 : i32
    %c0_i32_0 = arith.constant 0 : i32
    %c0_i32_1 = arith.constant 0 : i32
    return %arg0, %c0_i32, %c0_i32_0 : i32, i32, i32
  }
}

</mosaic_0001>

<bundles_post_ra>
// kernel: tpu_custom_call.1
= control target key start
LH: loop header
LB: loop body
LE: loop exit
PB: predicated region body
PF: predicated region fallthrough
CT: control target
= control target key end

     0   :  { %s5888_s0 = inlined_call_operand.vmem [shape: f32[2,8,1024], index: 0, kind: input, shape index: {}]   ;;  %s5889_s1 = inlined_call_operand.vmem [shape: f32[8,72], index: 1, kind: input, shape index: {}]   ;;  %s5890_s2 = inlined_call_operand.vmem [shape: f32[8,1], index: 2, kind: input, shape index: {}]   ;;  %s5891_s3 = inlined_call_operand.vmem [shape: f32[2,8], index: 3, kind: input, shape index: {}]   ;;  %s5892_s4 = inlined_call_operand.vmem [shape: f32[2,1], index: 4, kind: input, shape index: {}]   ;;  %s5893_s5 = inlined_call_operand.vmem [shape: f32[8,2], index: 5, kind: input, shape index: {}]   ;;  %s5894_s6 = inlined_call_operand.vmem [shape: f32[8,1], index: 6, kind: input, shape index: {}]   ;;  %s5895_s7 = inlined_call_operand.vmem [shape: f32[8,72], index: 7, kind: input, shape index: {}]   ;;  %s5896_s8 = inlined_call_operand.vmem [shape: f32[9,1024], index: 8, kind: input, shape index: {}]   ;;  %s5897_s9 = inlined_call_operand.vmem [shape: f32[1024,4], index: 9, kind: input, shape index: {}]   ;;  %s5898_s10 = inlined_call_operand.vmem [shape: f32[4,1024], index: 10, kind: input, shape index: {}]   ;;  %s5899_s11 = inlined_call_operand.hbm [shape: f32[2,8,1024], index: 11, kind: output, shape index: {}]  }
   0x1   :  { %5982 = sst [smem:[#allocation60_spill]] %s5888_s0 }
   0x2   :  { %5983 = sst [smem:[#allocation61_spill]] %s5889_s1 }
   0x3   :  { %5984 = sst [smem:[#allocation62_spill]] %s5890_s2 }
   0x4   :  { %5985 = sst [smem:[#allocation63_spill]] %s5896_s8 }
   0x5   :  { %16 = vsyncpa [#allocation5], 0 }
   0x6   :  { %18 = vsyncpa [#allocation5 + $0x1], 0  ;;  %s3893_s17 = smov 0   ;;  %s3895_s18 = smov 0  }
   0x7   :  { %s3897_s19 = smov 0   ;;  %s3899_s20 = smov 0  }
   0x8 LB: > { %s3914_s21 = sadd.s32 4294967295, %s3819_s20   ;;  %s3226_s22 = sadd.s32 4294967294, %s3819_s20   ;;  %s3819_s20 = sphi %s3899_s20, %s6129_s20   ;;  %s3815_s19 = sphi %s3897_s19, %s6128_s19   ;;  %s3811_s18 = sphi %s3895_s18, %s6127_s18   ;;  %s3807_s17 = sphi %s3893_s17, %s6126_s17  }
   0x9   : > { %s3918_s23 = sadd.s32 1, %s3819_s20   ;;  %s267_s24 = sadd.s32 1, %s3815_s19 }
   0xa   : > { %s264_s25 = ssub.s32 %s3819_s20, %s3918_s23  ;;  %p277_p0 = scmp.ne.s32.totalorder %s3815_s19, %s3811_s18 }
   0xb   : > { %p265_p1 = scmp.eq.s32.totalorder %s264_s25, 0  ;;  %p278_p2 = scmp.eq.s32.totalorder %s3914_s21, 1 }
   0xc   : > { %p283_p3 = scmp.ne.s32.totalorder %s3811_s18, %s3807_s17  ;;  %p284_p4 = scmp.eq.s32.totalorder %s3226_s22, 1 }
   0xd   : > { %s3929_s26 = scalar_select %p265_p1, %s3815_s19, %s267_s24  }
   0xe   : > { %p3931_p5 = por %p278_p2, %p277_p0  ;;  %p3935_p6 = por %p284_p4, %p283_p3 }
   0xf   : > { %5986 = sst [smem:[#allocation7_spill]] %s3929_s26  ;;  %p3229_p7 = scmp.ge.s32.totalorder %s3819_s20, 1 }
  0x10   : > { %p340_p8 = scmp.lt.s32.totalorder %s3819_s20, 3 }
  0x12   : > { %p341_p9 = pnand %p3229_p7, %p340_p8 }
  0x14   : > { %344 = sbr.rel (%p341_p9) target bundleno = 1869 (0x74d), region = 64 }
  0x1b   : > { %p380_p10 = scmp.lt.s32.totalorder %s3914_s21, 1  ;;  %s5989_s0 = sld [smem:[#allocation60_spill]]  ;;  %v5916_v14 = vmov 0.0   ;;  %v452_v17 = vlaneseq  ;;  %v3830_v37 = vmov 0   ;;  %vm1230_vm8 = vcmask 588800  }
  0x1c   : > { %s5900_s15 = smov 16   ;;  %s5904_s16 = smov 17   ;;  %1298 = vmatprep.mubr.f32.mxu0 %v5916_v14  ;;  %1369 = vmatprep.mubr.f32.mxu1 %v5916_v14  ;;  %vm3831_vm9 = vmmov 0   ;;  %vm1941_vm10 = vcmask 64512   ;;  %vm2027_vm11 = vcmask 1041408   ;;  %vm2023_vm12 = vcmask 15360  }
  0x1d   : > { %s381_s29 = scalar_select %p380_p10, %s3914_s21, 1  ;;  %v4092_v20 = vshrl.u32 %v452_v17, 7  ;;  %v4104_v23 = vand.u32 127, %v452_v17  ;;  %3739 = vset.pattern.permute.xlu0 %v3830_v37  ;;  %3740 = vset.pattern.permute.xlu1 %v3830_v37  ;;  %vm2123_vm13 = vcmask 1043456   ;;  %vm2119_vm14 = vcmask 31744  }
  0x1e   : > { %s5906_s22 = smov 15   ;;  %s5902_s24 = smov 1  }
  0x1f   : > { %s3277_s30 = sshll.u32 %s381_s29, 6  ;;  %s5914_s25 = smov 127   ;;  %v4111_v26 = vsub.s32 1, %v4092_v20  ;;  %v4114_v29 = vsub.s32 0, %v4092_v20  ;;  %vm536_vm0 = vcmp.lt.s32.totalorder %v4104_v23, 16  ;;  %vm454_vm1 = vcmp.lt.s32.totalorder %v4104_v23, 17 }
  0x20   : > { %s5912_s29 = smov 113   ;;  %s5908_s12 = smov 111   ;;  %v4159_v46 = vsub.s32 3, %v4092_v20  ;;  %v4168_v49 = vsub.s32 2, %v4092_v20  ;;  %vm618_vm2 = vcmp.lt.s32.totalorder %v4104_v23, 15  ;;  %vm700_vm3 = vcmp.lt.s32.totalorder %v4104_v23, 1 }
  0x21   : > { %s3946_s14 = scalar_lea.vmem %s5989_s0, %s3277_s30  ;;  %s5910_s30 = smov 112   ;;  %vm839_vm4 = vcmp.lt.s32.totalorder %v4104_v23, 127  ;;  %vm921_vm5 = vcmp.lt.s32.totalorder %v4104_v23, 113  ;;  %vm1003_vm6 = vcmp.lt.s32.totalorder %v4104_v23, 112  ;;  %vm1085_vm7 = vcmp.lt.s32.totalorder %v4104_v23, 111 }
  0x22   : > { %v385_v0 = vld [vmem:[%s3946_s14] sm:$0xff]  ;;  %v386_v1 = vld [vmem:[%s3946_s14 + $0x8] sm:$0xff]  ;;  %v392_v4 = vld [vmem:[%s3946_s14 + $0x38] sm:$0xff]  ;;  %s5990_s8 = sld [smem:[#allocation63_spill]]  ;;  %s5993_s0 = smov 111  }
  0x23   : > { %v3950_v2 = vmul.f32 0.5, %v385_v0  ;;  %v3956_v3 = vmul.f32 0.5, %v386_v1  ;;  %v3963_v5 = vmul.f32 0.5, %v392_v4  ;;  %v388_v6 = vld [vmem:[%s3946_s14 + $0x18] sm:$0xff]  ;;  %v387_v7 = vld [vmem:[%s3946_s14 + $0x10] sm:$0xff]  ;;  %v389_v10 = vld [vmem:[%s3946_s14 + $0x20] sm:$0xff] }
  0x24   : > { %v3971_v8 = vmul.f32 0.5, %v388_v6  ;;  %v3973_v9 = vmul.f32 0.5, %v387_v7  ;;  %v4012_v11 = vmul.f32 0.5, %v389_v10  ;;  %v390_v12 = vld [vmem:[%s3946_s14 + $0x28] sm:$0xff]  ;;  %v391_v15 = vld [vmem:[%s3946_s14 + $0x30] sm:$0xff]  ;;  %s5995_s2 = sld [smem:[#allocation62_spill]] }
  0x25   : > { %520 = vrot.lane.b32.xlu1 %v3950_v2, %s5900_s15  ;;  %436 = vrot.lane.b32.xlu0 %v3950_v2, %s5904_s16  ;;  %v4047_v13 = vmul.f32 0.5, %v390_v12  ;;  %v4060_v16 = vmul.f32 0.5, %v391_v15  ;;  %s6022_s1 = sld [smem:[#allocation61_spill]]  ;;  %s6053_s13 = smov 15  }
  0x28   : > { %v393_v18 = vld [vmem:[%s5990_s8] ss:$8 sm:$0xf]  ;;  %v3233_v21 = vld [vmem:[%s5990_s8 + $0x1] ss:$8 sm:$0xf] }
  0x29   : > { %522 = vrot.lane.b32.xlu1 %v3956_v3, %s5900_s15  ;;  %438 = vrot.lane.b32.xlu0 %v3956_v3, %s5904_s16  ;;  %v394_v19 = vld [vmem:[%s5990_s8] ss:$8 sm:$0xf0]  ;;  %v3234_v22 = vld [vmem:[%s5990_s8 + $0x1] ss:$8 sm:$0xf0] }
  0x2a   : > { %v4106_v24 = vor.u32 %v394_v19, %v393_v18  ;;  %v4108_v25 = vor.u32 %v3234_v22, %v3233_v21  ;;  %v1224_v50 = vld [vmem:[%s5995_s2] sm:$0xff]  ;;  %s6048_s2 = smov 17  }
  0x2b   : > { %v3235_v54 = vld [vmem:[%s5990_s8 + $0x2] ss:$8 sm:$0xf]  ;;  %v3237_v60 = vld [vmem:[%s5990_s8 + $0x3] ss:$8 sm:$0xf] }
  0x2c   : > { %v4124_v30 = vrot.slane %v4106_v24, %v4111_v26  ;;  %v4128_v31 = vrot.slane %v4108_v25, %v4111_v26  ;;  %v4136_v36 = vrot.slane %v4106_v24, %v4114_v29  ;;  %v4146_v40 = vrot.slane %v4108_v25, %v4114_v29  ;;  %v3236_v55 = vld [vmem:[%s5990_s8 + $0x2] ss:$8 sm:$0xf0]  ;;  %v3238_v61 = vld [vmem:[%s5990_s8 + $0x3] ss:$8 sm:$0xf0] }
  0x2d   : > { %534 = vrot.lane.b32.xlu1 %v3963_v5, %s5900_s15  ;;  %450 = vrot.lane.b32.xlu0 %v3963_v5, %s5904_s16  ;;  %v4183_v56 = vrot.slane %v4106_v24, %v4159_v46  ;;  %v4187_v57 = vrot.slane %v4108_v25, %v4159_v46  ;;  %v4191_v58 = vrot.slane %v4106_v24, %v4168_v49 }
  0x2e   : > { %5992 = vst [vmem:[#allocation8_spill] sm:$0xff] %v4136_v36  ;;  %5994 = vst [vmem:[#allocation9_spill] sm:$0xff] %v4146_v40  ;;  %v4195_v59 = vrot.slane %v4108_v25, %v4168_v49  ;;  %v4212_v6 = vor.u32 %v3236_v55, %v3235_v54  ;;  %v4217_v10 = vor.u32 %v3238_v61, %v3237_v60  ;;  %v3240_v54 = vld [vmem:[%s5990_s8 + $0x4] ss:$8 sm:$0xf0] }
  0x2f   : > { %v3241_v61 = vld [vmem:[%s5990_s8 + $0x5] ss:$8 sm:$0xf] }
  0x31   : > { %442 = vrot.lane.b32.xlu1 %v3971_v8, %s5904_s16  ;;  %440 = vrot.lane.b32.xlu0 %v3973_v9, %s5904_s16 }
  0x35   : > { %526 = vrot.lane.b32.xlu1 %v3971_v8, %s5900_s15  ;;  %524 = vrot.lane.b32.xlu0 %v3973_v9, %s5900_s15 }
  0x39   : > { %604 = vrot.lane.b32.xlu1 %v3956_v3, %s5906_s22  ;;  %602 = vrot.lane.b32.xlu0 %v3950_v2, %s5906_s22 }
  0x3d   : > { %686 = vrot.lane.b32.xlu1 %v3956_v3, %s5902_s24  ;;  %684 = vrot.lane.b32.xlu0 %v3950_v2, %s5902_s24 }
  0x41   : > { %698 = vrot.lane.b32.xlu1 %v3963_v5, %s5902_s24  ;;  %616 = vrot.lane.b32.xlu0 %v3963_v5, %s5906_s22 }
  0x45   : > { %608 = vrot.lane.b32.xlu1 %v3971_v8, %s5906_s22  ;;  %606 = vrot.lane.b32.xlu0 %v3973_v9, %s5906_s22 }
  0x49   : > { %690 = vrot.lane.b32.xlu1 %v3971_v8, %s5902_s24  ;;  %688 = vrot.lane.b32.xlu0 %v3973_v9, %s5902_s24 }
  0x4d   : > { %827 = vrot.lane.b32.xlu1 %v3973_v9, %s5914_s25  ;;  %825 = vrot.lane.b32.xlu0 %v3956_v3, %s5914_s25 }
  0x51   : > { %829 = vrot.lane.b32.xlu1 %v3971_v8, %s5914_s25  ;;  %823 = vrot.lane.b32.xlu0 %v3950_v2, %s5914_s25 }
  0x55   : > { %907 = vrot.lane.b32.xlu1 %v3956_v3, %s5912_s29  ;;  %831 = vrot.lane.b32.xlu0 %v4012_v11, %s5914_s25 }
  0x59   : > { %989 = vrot.lane.b32.xlu1 %v3956_v3, %s5910_s30  ;;  %909 = vrot.lane.b32.xlu0 %v3973_v9, %s5912_s29 }
  0x5d   : > { %905 = vrot.lane.b32.xlu1 %v3950_v2, %s5912_s29  ;;  %991 = vrot.lane.b32.xlu0 %v3973_v9, %s5910_s30 }
  0x61   : > { %911 = vrot.lane.b32.xlu1 %v3971_v8, %s5912_s29  ;;  %987 = vrot.lane.b32.xlu0 %v3950_v2, %s5910_s30 }
  0x65   : > { %993 = vrot.lane.b32.xlu1 %v3971_v8, %s5910_s30  ;;  %913 = vrot.lane.b32.xlu0 %v4012_v11, %s5912_s29 }
  0x69   : > { %1071 = vrot.lane.b32.xlu1 %v3956_v3, %s5908_s12  ;;  %995 = vrot.lane.b32.xlu0 %v4012_v11, %s5910_s30 }
  0x6d   : > { %1069 = vrot.lane.b32.xlu1 %v3950_v2, %s5908_s12  ;;  %1073 = vrot.lane.b32.xlu0 %v3973_v9, %s5908_s12 }
  0x71   : > { %1077 = vrot.lane.b32.xlu1 %v4012_v11, %s5908_s12  ;;  %1075 = vrot.lane.b32.xlu0 %v3971_v8, %s5908_s12  ;;  %s6049_s12 = smov 113  }
  0x75   : > { %446 = vrot.lane.b32.xlu1 %v4047_v13, %s5904_s16  ;;  %444 = vrot.lane.b32.xlu0 %v4012_v11, %s5904_s16 }
  0x79   : > { %530 = vrot.lane.b32.xlu1 %v4047_v13, %s5900_s15  ;;  %528 = vrot.lane.b32.xlu0 %v4012_v11, %s5900_s15 }
  0x7d   : > { %532 = vrot.lane.b32.xlu1 %v4060_v16, %s5900_s15  ;;  %448 = vrot.lane.b32.xlu0 %v4060_v16, %s5904_s16  ;;  %s5991_s15 = smov 112   ;;  %s6054_s16 = smov 1  }
  0x81   : > { %612 = vrot.lane.b32.xlu1 %v4047_v13, %s5906_s22  ;;  %610 = vrot.lane.b32.xlu0 %v4012_v11, %s5906_s22 }
  0x85   : > { %694 = vrot.lane.b32.xlu1 %v4047_v13, %s5902_s24  ;;  %692 = vrot.lane.b32.xlu0 %v4012_v11, %s5902_s24 }
  0x89   : > { %696 = vrot.lane.b32.xlu1 %v4060_v16, %s5902_s24  ;;  %614 = vrot.lane.b32.xlu0 %v4060_v16, %s5906_s22  ;;  %s377_s22 = sand.u32 1, %s3811_s18  }
  0x8a   : > { %s3230_s24 = sshll.u32 %s377_s22, 6 }
  0x8b   : > { %s5823_s30 = scalar_lea.vmem [#allocation4], %s3230_s24 }
  0x8c   : > { %s3167_s26 = sshll.u32 %s5823_s30, 4  ;;  %s5844_s26 = int_to_ptr.vmem [resolvable:$true] %s3167_s26 }
  0x8d   : > { %835 = vrot.lane.b32.xlu1 %v4060_v16, %s5914_s25  ;;  %833 = vrot.lane.b32.xlu0 %v4047_v13, %s5914_s25 }
  0x91   : > { %915 = vrot.lane.b32.xlu1 %v4047_v13, %s5912_s29  ;;  %837 = vrot.lane.b32.xlu0 %v3963_v5, %s5914_s25  ;;  %s3278_s25 = sshll.u32 %s3914_s21, 10  ;;  %s3153_s21 = scalar_lea.sflag [#allocation5], %s377_s22 }
  0x95   : > { %997 = vrot.lane.b32.xlu1 %v4047_v13, %s5991_s15  ;;  %917 = vrot.lane.b32.xlu0 %v4060_v16, %s5912_s29 }
  0x97   : > { %v521_v27 = vpop.permute.xlu1 %520  ;;  %v437_v28 = vpop.permute.xlu0 %436 }
  0x99   : > { %919 = vrot.lane.b32.xlu1 %v3963_v5, %s5912_s29  ;;  %999 = vrot.lane.b32.xlu0 %v4060_v16, %s5991_s15 }
  0x9b   : > { %v523_v32 = vpop.permute.xlu1 %522  ;;  %v439_v33 = vpop.permute.xlu0 %438 }
  0x9c   : > { %v461_v34 = vsel %vm454_vm1, %v437_v28, %v439_v33  ;;  %v543_v35 = vsel %vm536_vm0, %v521_v27, %v523_v32 }
  0x9d   : > { %1079 = vrot.lane.b32.xlu1 %v4047_v13, %s5993_s0  ;;  %1001 = vrot.lane.b32.xlu0 %v3963_v5, %s5991_s15  ;;  %v505_v38 = vmul.f32 %v4124_v30, %v461_v34  ;;  %v587_v39 = vmul.f32 %v4128_v31, %v543_v35 }
  0x9f   : > { %v4148_v41 = vpop.permute.xlu1 %534  ;;  %v4150_v42 = vpop.permute.xlu0 %450  ;;  %v3433_v43 = vpack.c.bf16 %v587_v39, %v505_v38 }
  0xa0   : > { %v544_v44 = vsel %vm536_vm0, %v4148_v41, %v521_v27  ;;  %v462_v45 = vsel %vm454_vm1, %v4150_v42, %v437_v28  ;;  %v4226_v28 = vrot.slane %v4212_v6, %v4111_v26 }
  0xa1   : > { %1083 = vrot.lane.b32.xlu1 %v3963_v5, %s5993_s0  ;;  %1081 = vrot.lane.b32.xlu0 %v4060_v16, %s5993_s0  ;;  %v504_v47 = vmul.f32 %v4136_v36, %v462_v45  ;;  %v586_v48 = vmul.f32 %v4146_v40, %v544_v44  ;;  %v4245_v44 = vrot.slane %v4212_v6, %v4114_v29 }
  0xa2   : > { %3434 = vmatprep.subr.bf16.mxu0 %v3433_v43  ;;  %5996 = vst [vmem:[#allocation10_spill] sm:$0xff] %v4226_v28  ;;  %v4241_v43 = vrot.slane %v4217_v10, %v4114_v29 }
  0xa3   : > { %v4173_v51 = vpop.permute.xlu1 %442  ;;  %v441_v52 = vpop.permute.xlu0 %440  ;;  %v3435_v53 = vpack.c.bf16 %v586_v48, %v504_v47  ;;  %5999 = vst [vmem:[#allocation13_spill] sm:$0xff] %v4245_v44 }
  0xa4   : > { %v460_v62 = vsel %vm454_vm1, %v439_v33, %v441_v52  ;;  %v459_v63 = vsel %vm454_vm1, %v441_v52, %v4173_v51  ;;  %5998 = vst [vmem:[#allocation12_spill] sm:$0xff] %v4241_v43 }
  0xa5   : > { %3436 = vmatpush1.bf16.msra.mxu0 %v3435_v53  ;;  %1227 = vperm.xlu0 %3739, %v1224_v50   ;;  %v507_v12 = vmul.f32 %v4183_v56, %v459_v63  ;;  %v506_v17 = vmul.f32 %v4191_v58, %v460_v62  ;;  %v3239_v53 = vld [vmem:[%s5990_s8 + $0x4] ss:$8 sm:$0xf]  ;;  %v3242_v62 = vld [vmem:[%s5990_s8 + $0x5] ss:$8 sm:$0xf0] }
  0xa7   : > { %v4208_v0 = vpop.permute.xlu1 %526  ;;  %v525_v1 = vpop.permute.xlu0 %524 }
  0xa8   : > { %v542_v4 = vsel %vm536_vm0, %v523_v32, %v525_v1  ;;  %v541_v7 = vsel %vm536_vm0, %v525_v1, %v4208_v0  ;;  %v4231_v32 = vrot.slane %v4217_v10, %v4111_v26 }
  0xa9   : > { %v589_v15 = vmul.f32 %v4187_v57, %v541_v7  ;;  %v588_v18 = vmul.f32 %v4195_v59, %v542_v4  ;;  %v4273_v7 = vor.u32 %v3240_v54, %v3239_v53 }
  0xaa   : > { %5997 = vst [vmem:[#allocation11_spill] sm:$0xff] %v4231_v32 }
  0xab   : > { %v605_v19 = vpop.permute.xlu1 %604  ;;  %v603_v21 = vpop.permute.xlu0 %602  ;;  %v3449_v22 = vpack.c.bf16 %v589_v15, %v507_v12  ;;  %v3451_v27 = vpack.c.bf16 %v588_v18, %v506_v17  ;;  %v4275_v12 = vor.u32 %v3242_v62, %v3241_v61  ;;  %v4279_v15 = vrot.slane %v4212_v6, %v4168_v49 }
  0xac   : > { %v625_v33 = vsel %vm618_vm2, %v603_v21, %v605_v19  ;;  %v4283_v17 = vrot.slane %v4212_v6, %v4159_v46  ;;  %v4287_v18 = vrot.slane %v4217_v10, %v4168_v49  ;;  %v4322_v62 = vrot.slane %v4273_v7, %v4114_v29 }
  0xad   : > { %3450 = vmatprep.subr.bf16.mxu1 %v3449_v22  ;;  %v669_v38 = vmul.f32 %v4226_v28, %v625_v33  ;;  %6000 = vst [vmem:[#allocation14_spill] sm:$0xff] %v4279_v15 }
  0xae   : > { %3452 = vmatpush1.bf16.msra.mxu1 %v3451_v27  ;;  %6004 = vst [vmem:[#allocation18_spill] sm:$0xff] %v4322_v62 }
  0xaf   : > { %v687_v34 = vpop.permute.xlu1 %686  ;;  %v685_v35 = vpop.permute.xlu0 %684 }
  0xb0   : > { %v707_v37 = vsel %vm700_vm3, %v685_v35, %v687_v34 }
  0xb1   : > { %v751_v39 = vmul.f32 %v4231_v32, %v707_v37  ;;  %v4302_v37 = vrot.slane %v4273_v7, %v4111_v26 }
  0xb3   : > { %v4247_v45 = vpop.permute.xlu1 %698  ;;  %v4249_v47 = vpop.permute.xlu0 %616  ;;  %v3437_v48 = vpack.c.bf16 %v751_v39, %v669_v38  ;;  %6002 = vst [vmem:[#allocation16_spill] sm:$0xff] %v4302_v37 }
  0xb4   : > { %v708_v50 = vsel %vm700_vm3, %v4247_v45, %v685_v35  ;;  %v626_v52 = vsel %vm618_vm2, %v4249_v47, %v603_v21  ;;  %v4291_v21 = vrot.slane %v4217_v10, %v4159_v46 }
  0xb5   : > { %v750_v55 = vmul.f32 %v4241_v43, %v708_v50  ;;  %v668_v60 = vmul.f32 %v4245_v44, %v626_v52  ;;  %3438 = vmatprep.subr.bf16.mxu0 %v3437_v48  ;;  %v4312_v48 = vrot.slane %v4275_v12, %v4111_v26 }
  0xb6   : > { %6001 = vst [vmem:[#allocation15_spill] sm:$0xff] %v4291_v21 }
  0xb7   : > { %v4271_v63 = vpop.permute.xlu1 %608  ;;  %v607_v1 = vpop.permute.xlu0 %606  ;;  %v3439_v4 = vpack.c.bf16 %v750_v55, %v668_v60  ;;  %6003 = vst [vmem:[#allocation17_spill] sm:$0xff] %v4312_v48 }
  0xb8   : > { %v623_v22 = vsel %vm618_vm2, %v607_v1, %v4271_v63  ;;  %v624_v27 = vsel %vm618_vm2, %v605_v19, %v607_v1 }
  0xb9   : > { %3440 = vmatpush1.bf16.msra.mxu0 %v3439_v4  ;;  %v670_v19 = vmul.f32 %v4279_v15, %v624_v27  ;;  %v671_v50 = vmul.f32 %v4283_v17, %v623_v22  ;;  %v4329_v22 = vrot.slane %v4275_v12, %v4114_v29 }
  0xbb   : > { %v4298_v33 = vpop.permute.xlu1 %690  ;;  %v689_v35 = vpop.permute.xlu0 %688  ;;  %6005 = vst [vmem:[#allocation19_spill] sm:$0xff] %v4329_v22 }
  0xbc   : > { %v705_v38 = vsel %vm700_vm3, %v689_v35, %v4298_v33  ;;  %v706_v39 = vsel %vm700_vm3, %v687_v34, %v689_v35  ;;  %v808_v34 = vmul.f32 %v4302_v37, %v3956_v3  ;;  %v807_v3 = vmul.f32 %v4322_v62, %v3950_v2 }
  0xbd   : > { %v752_v52 = vmul.f32 %v4287_v18, %v706_v39  ;;  %v753_v53 = vmul.f32 %v4291_v21, %v705_v38  ;;  %v4337_v39 = vrot.slane %v4273_v7, %v4159_v46 }
  0xbf   : > { %v828_v54 = vpop.permute.xlu1 %827  ;;  %v826_v55 = vpop.permute.xlu0 %825  ;;  %v3453_v60 = vpack.c.bf16 %v753_v53, %v671_v50  ;;  %v3455_v61 = vpack.c.bf16 %v752_v52, %v670_v19  ;;  %6006 = vst [vmem:[#allocation20_spill] sm:$0xff] %v4337_v39  ;;  %v4341_v19 = vrot.slane %v4275_v12, %v4168_v49  ;;  %v4348_v52 = vrot.slane %v4273_v7, %v4168_v49 }
  0xc0   : > { %v845_v1 = vsel %vm839_vm4, %v826_v55, %v828_v54 }
  0xc1   : > { %v890_v4 = vmul.f32 %v4312_v48, %v845_v1  ;;  %3454 = vmatprep.subr.bf16.mxu1 %v3453_v60  ;;  %6007 = vst [vmem:[#allocation21_spill] sm:$0xff] %v4341_v19  ;;  %6008 = vst [vmem:[#allocation22_spill] sm:$0xff] %v4348_v52  ;;  %v4355_v60 = vrot.slane %v4275_v12, %v4159_v46 }
  0xc2   : > { %3456 = vmatpush1.bf16.msra.mxu1 %v3455_v61  ;;  %v3243_v61 = vld [vmem:[%s5990_s8 + $0x6] ss:$8 sm:$0xf] }
  0xc3   : > { %v830_v27 = vpop.permute.xlu1 %829  ;;  %v4331_v35 = vpop.permute.xlu0 %823  ;;  %v3441_v38 = vpack.c.bf16 %v890_v4, %v808_v34  ;;  %6009 = vst [vmem:[#allocation23_spill] sm:$0xff] %v4355_v60  ;;  %v3245_v34 = vld [vmem:[%s5990_s8 + $0x7] ss:$8 sm:$0xf] }
  0xc4   : > { %v846_v50 = vsel %vm839_vm4, %v4331_v35, %v826_v55  ;;  %v844_v53 = vsel %vm839_vm4, %v828_v54, %v830_v27  ;;  %v3244_v55 = vld [vmem:[%s5990_s8 + $0x6] ss:$8 sm:$0xf0]  ;;  %v3246_v54 = vld [vmem:[%s5990_s8 + $0x7] ss:$8 sm:$0xf0] }
  0xc5   : > { %v889_v2 = vmul.f32 %v4329_v22, %v846_v50  ;;  %3442 = vmatprep.subr.bf16.mxu0 %v3441_v38  ;;  %v810_v50 = vmul.f32 %v4337_v39, %v3971_v8  ;;  %v891_v14 = vmul.f32 %v4341_v19, %v844_v53  ;;  %v809_v22 = vmul.f32 %v4348_v52, %v3973_v9 }
  0xc6   : > { %v4380_v44 = vor.u32 %v3244_v55, %v3243_v61  ;;  %v4382_v28 = vor.u32 %v3246_v54, %v3245_v34 }
  0xc7   : > { %v908_v1 = vpop.permute.xlu1 %907  ;;  %v4369_v4 = vpop.permute.xlu0 %831  ;;  %v3443_v38 = vpack.c.bf16 %v889_v2, %v807_v3  ;;  %v3459_v53 = vpack.c.bf16 %v891_v14, %v809_v22 }
  0xc8   : > { %v843_v62 = vsel %vm839_vm4, %v830_v27, %v4369_v4  ;;  %v4387_v40 = vrot.slane %v4380_v44, %v4111_v26  ;;  %v4392_v9 = vrot.slane %v4382_v28, %v4111_v26  ;;  %v4403_v22 = vrot.slane %v4380_v44, %v4114_v29 }
  0xc9   : > { %v892_v43 = vmul.f32 %v4355_v60, %v843_v62  ;;  %3444 = vmatpush1.bf16.msra.mxu0 %v3443_v38  ;;  %v4408_v34 = vrot.slane %v4382_v28, %v4114_v29 }
  0xca   : > { %6010 = vst [vmem:[#allocation24_spill] sm:$0xff] %v4387_v40  ;;  %6011 = vst [vmem:[#allocation25_spill] sm:$0xff] %v4392_v9 }
  0xcb   : > { %v990_v3 = vpop.permute.xlu1 %989  ;;  %v910_v8 = vpop.permute.xlu0 %909  ;;  %v3457_v2 = vpack.c.bf16 %v892_v43, %v810_v50  ;;  %6012 = vst [vmem:[#allocation26_spill] sm:$0xff] %v4403_v22  ;;  %6013 = vst [vmem:[#allocation27_spill] sm:$0xff] %v4408_v34 }
  0xcc   : > { %v927_v62 = vsel %vm921_vm5, %v908_v1, %v910_v8 }
  0xcd   : > { %3458 = vmatprep.subr.bf16.mxu1 %v3457_v2  ;;  %v972_v43 = vmul.f32 %v4387_v40, %v927_v62  ;;  %v3247_v40 = vld [vmem:[%s5990_s8 + $0x40] ss:$8 sm:$0xf] }
  0xce   : > { %3460 = vmatpush1.bf16.msra.mxu1 %v3459_v53 }
  0xcf   : > { %v4396_v27 = vpop.permute.xlu1 %905  ;;  %v992_v61 = vpop.permute.xlu0 %991 }
  0xd0   : > { %v1009_v14 = vsel %vm1003_vm6, %v990_v3, %v992_v61  ;;  %v928_v54 = vsel %vm921_vm5, %v4396_v27, %v908_v1  ;;  %v3248_v1 = vld [vmem:[%s5990_s8 + $0x40] ss:$8 sm:$0xf0]  ;;  %s6050_s8 = smov 16  }
  0xd1   : > { %v1054_v55 = vmul.f32 %v4392_v9, %v1009_v14  ;;  %v971_v62 = vmul.f32 %v4403_v22, %v928_v54  ;;  %v4436_v54 = vrot.slane %v4380_v44, %v4159_v46 }
  0xd3   : > { %v912_v38 = vpop.permute.xlu1 %911  ;;  %v4413_v50 = vpop.permute.xlu0 %987  ;;  %v3445_v2 = vpack.c.bf16 %v1054_v55, %v972_v43  ;;  %6015 = vst [vmem:[#allocation29_spill] sm:$0xff] %v4436_v54 }
  0xd4   : > { %v1010_v53 = vsel %vm1003_vm6, %v4413_v50, %v990_v3  ;;  %v4430_v3 = vrot.slane %v4382_v28, %v4168_v49 }
  0xd5   : > { %v1053_v14 = vmul.f32 %v4408_v34, %v1010_v53  ;;  %3446 = vmatprep.subr.bf16.mxu0 %v3445_v2  ;;  %v4440_v2 = vrot.slane %v4382_v28, %v4159_v46  ;;  %v4442_v53 = vor.u32 %v3248_v1, %v3247_v40 }
  0xd6   : > { %6014 = vst [vmem:[#allocation28_spill] sm:$0xff] %v4430_v3 }
  0xd7   : > { %v994_v9 = vpop.permute.xlu1 %993  ;;  %v4426_v36 = vpop.permute.xlu0 %913  ;;  %v3447_v43 = vpack.c.bf16 %v1053_v14, %v971_v62  ;;  %6016 = vst [vmem:[#allocation30_spill] sm:$0xff] %v4440_v2  ;;  %v4446_v62 = vrot.slane %v4380_v44, %v4168_v49  ;;  %v4464_v39 = vrot.slane %v4442_v53, %v4114_v29 }
  0xd8   : > { %v1008_v55 = vsel %vm1003_vm6, %v992_v61, %v994_v9  ;;  %v925_v14 = vsel %vm921_vm5, %v912_v38, %v4426_v36  ;;  %v926_v61 = vsel %vm921_vm5, %v910_v8, %v912_v38  ;;  %v4468_v8 = vrot.slane %v4442_v53, %v4111_v26 }
  0xd9   : > { %3448 = vmatpush1.bf16.msra.mxu0 %v3447_v43  ;;  %6017 = vst [vmem:[#allocation31_spill] sm:$0xff] %v4446_v62  ;;  %v1055_v43 = vmul.f32 %v4430_v3, %v1008_v55  ;;  %v974_v1 = vmul.f32 %v4436_v54, %v925_v14  ;;  %6018 = vst [vmem:[#allocation32_spill] sm:$0xff] %v4464_v39  ;;  %v973_v38 = vmul.f32 %v4446_v62, %v926_v61  ;;  %v4491_v61 = vld [vmem:[%s6022_s1] sm:$0xff]  ;;  %s6047_s1 = smov 127  }
  0xda   : > { %6019 = vst [vmem:[#allocation33_spill] sm:$0xff] %v4468_v8  ;;  %v4482_v26 = vrot.slane %v4442_v53, %v4168_v49 }
  0xdb   : > { %v1072_v22 = vpop.permute.xlu1 %1071  ;;  %v4453_v34 = vpop.permute.xlu0 %995  ;;  %v3463_v54 = vpack.c.bf16 %v1055_v43, %v973_v38  ;;  %v4503_v38 = vsub.s32 4, %v4092_v20 }
  0xdc   : > { %v1007_v40 = vsel %vm1003_vm6, %v994_v9, %v4453_v34  ;;  %6020 = vst [vmem:[#allocation34_spill] sm:$0xff] %v4482_v26 }
  0xdd   : > { %v1056_v32 = vmul.f32 %v4440_v2, %v1007_v40 }
  0xdf   : > { %v4471_v55 = vpop.permute.xlu1 %1069  ;;  %v1074_v3 = vpop.permute.xlu0 %1073  ;;  %v3461_v9 = vpack.c.bf16 %v1056_v32, %v974_v1  ;;  %v4486_v32 = vrot.slane %v4442_v53, %v4159_v46 }
  0xe0   : > { %v1092_v14 = vsel %vm1085_vm7, %v4471_v55, %v1072_v22  ;;  %v1091_v40 = vsel %vm1085_vm7, %v1072_v22, %v1074_v3 }
  0xe1   : > { %v1135_v29 = vmul.f32 %v4464_v39, %v1092_v14  ;;  %v1136_v60 = vmul.f32 %v4468_v8, %v1091_v40  ;;  %3462 = vmatprep.subr.bf16.mxu1 %v3461_v9  ;;  %6021 = vst [vmem:[#allocation35_spill] sm:$0xff] %v4486_v32  ;;  %v4506_v9 = vsub.s32 5, %v4092_v20 }
  0xe2   : > { %3464 = vmatpush1.bf16.msra.mxu1 %v3463_v54 }
  0xe3   : > { %v4493_v22 = vpop.permute.xlu1 %1077  ;;  %v1076_v43 = vpop.permute.xlu0 %1075  ;;  %1250 = vmatprep.subr.mxu0 %v1136_v60  ;;  %v6023_v60 = vmov 0.0  }
  0xe4   : > { %v1089_v49 = vsel %vm1085_vm7, %v1076_v43, %v4493_v22  ;;  %v1090_v1 = vsel %vm1085_vm7, %v1074_v3, %v1076_v43  ;;  %1251 = vmatpush1.msra.mxu0 %v1135_v29  ;;  %v4512_v3 = vsub.s32 6, %v4092_v20  ;;  %v4515_v29 = vsub.s32 7, %v4092_v20 }
  0xe5   : > { %v1137_v46 = vmul.f32 %v4482_v26, %v1090_v1  ;;  %v1138_v54 = vmul.f32 %v4486_v32, %v1089_v49  ;;  %3249 = vmatmul.mubr.msk.f32.vlgmr.msra.gmra.mrb[0].mxu0 %vm1230_vm8, %v4491_v61  ;;  %v4519_v43 = vrot.slane %v4106_v24, %v4503_v38  ;;  %v4523_v49 = vrot.slane %v4106_v24, %v4506_v9 }
  0xe6   : > { %1440 = vmatprep.mubr.f32.mxu0 %v6023_v60  ;;  %v4527_v1 = vrot.slane %v4108_v25, %v4503_v38  ;;  %v4543_v26 = vrot.slane %v4108_v25, %v4512_v3  ;;  %v4547_v32 = vrot.slane %v4108_v25, %v4515_v29 }
  0xe7   : > { %v447_v14 = vpop.permute.xlu1 %446  ;;  %1321 = vmatprep.subr.mxu1 %v1138_v54  ;;  %v445_v40 = vpop.permute.xlu0 %444  ;;  %v4531_v54 = vrot.slane %v4108_v25, %v4506_v9 }
  0xe8   : > { %1322 = vmatpush1.msra.mxu1 %v1137_v46  ;;  %v457_v20 = vsel %vm454_vm1, %v445_v40, %v447_v14  ;;  %v458_v46 = vsel %vm454_vm1, %v4173_v51, %v445_v40  ;;  %6025 = vst [vmem:[#allocation37_spill] sm:$0xff] %v4543_v26  ;;  %v4556_v51 = vrot.slane %v4106_v24, %v4512_v3 }
  0xe9   : > { %6024 = vst [vmem:[#allocation36_spill] sm:$0xff] %v4531_v54  ;;  %3250 = vmatmul.mubr.msk.f32.vlgmr.msra.gmra.mrb[0].mxu1 %vm1230_vm8, %v4491_v61  ;;  %v4560_v40 = vrot.slane %v4106_v24, %v4515_v29  ;;  %v508_v19 = vmul.f32 %v4519_v43, %v458_v46  ;;  %v509_v25 = vmul.f32 %v4523_v49, %v457_v20 }
  0xea   : > { %1511 = vmatprep.mubr.f32.mxu1 %v6023_v60  ;;  %6026 = vst [vmem:[#allocation38_spill] sm:$0xff] %v4556_v51 }
  0xeb   : > { %v531_v39 = vpop.permute.xlu1 %530  ;;  %v529_v8 = vpop.permute.xlu0 %528 }
  0xec   : > { %v539_v62 = vsel %vm536_vm0, %v529_v8, %v531_v39  ;;  %v540_v2 = vsel %vm536_vm0, %v4208_v0, %v529_v8 }
  0xed   : > { %v590_v52 = vmul.f32 %v4527_v1, %v540_v2  ;;  %v591_v37 = vmul.f32 %v4531_v54, %v539_v62 }
  0xef   : > { %v3467_v48 = vpack.c.bf16 %v590_v52, %v508_v19  ;;  %v533_v15 = vpop.permute.xlu1 %532  ;;  %v449_v21 = vpop.permute.xlu0 %448  ;;  %v3465_v0 = vpack.c.bf16 %v591_v37, %v509_v25 }
  0xf0   : > { %v537_v8 = vsel %vm536_vm0, %v533_v15, %v4148_v41  ;;  %v538_v24 = vsel %vm536_vm0, %v531_v39, %v533_v15  ;;  %v455_v46 = vsel %vm454_vm1, %v449_v21, %v4150_v42  ;;  %v456_v2 = vsel %vm454_vm1, %v447_v14, %v449_v21 }
  0xf1   : > { %v592_v62 = vmul.f32 %v4543_v26, %v538_v24  ;;  %v593_v19 = vmul.f32 %v4547_v32, %v537_v8  ;;  %v510_v37 = vmul.f32 %v4556_v51, %v456_v2  ;;  %v511_v52 = vmul.f32 %v4560_v40, %v455_v46  ;;  %3466 = vmatprep.subr.bf16.mxu0 %v3465_v0 }
  0xf2   : > { %3468 = vmatpush1.bf16.msra.mxu0 %v3467_v48  ;;  %v4582_v42 = vrot.slane %v4212_v6, %v4503_v38  ;;  %v4586_v21 = vrot.slane %v4212_v6, %v4506_v9  ;;  %v4590_v14 = vrot.slane %v4217_v10, %v4503_v38  ;;  %v4594_v48 = vrot.slane %v4217_v10, %v4506_v9 }
  0xf3   : > { %v3483_v41 = vpack.c.bf16 %v592_v62, %v510_v37  ;;  %v613_v20 = vpop.permute.xlu1 %612  ;;  %v611_v15 = vpop.permute.xlu0 %610  ;;  %v3481_v39 = vpack.c.bf16 %v593_v19, %v511_v52  ;;  %v4603_v46 = vrot.slane %v4217_v10, %v4512_v3  ;;  %v4607_v2 = vrot.slane %v4217_v10, %v4515_v29 }
  0xf4   : > { %6027 = vst [vmem:[#allocation39_spill] sm:$0xff] %v4586_v21  ;;  %6028 = vst [vmem:[#allocation40_spill] sm:$0xff] %v4594_v48  ;;  %v621_v25 = vsel %vm618_vm2, %v611_v15, %v613_v20  ;;  %v622_v0 = vsel %vm618_vm2, %v4271_v63, %v611_v15  ;;  %v4616_v63 = vrot.slane %v4212_v6, %v4512_v3 }
  0xf5   : > { %3482 = vmatprep.subr.bf16.mxu1 %v3481_v39  ;;  %v4620_v37 = vrot.slane %v4212_v6, %v4515_v29  ;;  %v672_v52 = vmul.f32 %v4582_v42, %v622_v0  ;;  %v673_v10 = vmul.f32 %v4586_v21, %v621_v25  ;;  %v4628_v39 = vrot.slane %v4273_v7, %v4503_v38 }
  0xf6   : > { %3484 = vmatpush1.bf16.msra.mxu1 %v3483_v41  ;;  %v4636_v0 = vrot.slane %v4275_v12, %v4503_v38  ;;  %v4640_v25 = vrot.slane %v4275_v12, %v4506_v9 }
  0xf7   : > { %v695_v8 = vpop.permute.xlu1 %694  ;;  %v693_v24 = vpop.permute.xlu0 %692  ;;  %6029 = vst [vmem:[#allocation41_spill] sm:$0xff] %v4628_v39 }
  0xf8   : > { %v703_v62 = vsel %vm700_vm3, %v693_v24, %v695_v8  ;;  %v704_v19 = vsel %vm700_vm3, %v4298_v33, %v693_v24  ;;  %v4632_v33 = vrot.slane %v4273_v7, %v4506_v9  ;;  %6031 = vst [vmem:[#allocation43_spill] sm:$0xff] %v4636_v0 }
  0xf9   : > { %v754_v41 = vmul.f32 %v4590_v14, %v704_v19  ;;  %v755_v15 = vmul.f32 %v4594_v48, %v703_v62 }
  0xfa   : > { %6030 = vst [vmem:[#allocation42_spill] sm:$0xff] %v4632_v33 }
  0xfb   : > { %v3471_v24 = vpack.c.bf16 %v754_v41, %v672_v52  ;;  %v697_v26 = vpop.permute.xlu1 %696  ;;  %v615_v6 = vpop.permute.xlu0 %614  ;;  %v3469_v54 = vpack.c.bf16 %v755_v15, %v673_v10 }
  0xfc   : > { %v701_v62 = vsel %vm700_vm3, %v697_v26, %v4247_v45  ;;  %v702_v19 = vsel %vm700_vm3, %v695_v8, %v697_v26  ;;  %v619_v52 = vsel %vm618_vm2, %v615_v6, %v4249_v47  ;;  %v620_v10 = vsel %vm618_vm2, %v613_v20, %v615_v6 }
  0xfd   : > { %v756_v41 = vmul.f32 %v4603_v46, %v702_v19  ;;  %v757_v15 = vmul.f32 %v4607_v2, %v701_v62  ;;  %v674_v21 = vmul.f32 %v4616_v63, %v620_v10  ;;  %v675_v48 = vmul.f32 %v4620_v37, %v619_v52  ;;  %3470 = vmatprep.subr.bf16.mxu0 %v3469_v54 }
  0xfe   : > { %3472 = vmatpush1.bf16.msra.mxu0 %v3471_v24  ;;  %v811_v45 = vmul.f32 %v4628_v39, %v4012_v11  ;;  %v812_v26 = vmul.f32 %v4632_v33, %v4047_v13  ;;  %v4662_v6 = vrot.slane %v4273_v7, %v4512_v3  ;;  %v4666_v62 = vrot.slane %v4273_v7, %v4515_v29 }
  0xff   : > { %v3487_v47 = vpack.c.bf16 %v756_v41, %v674_v21  ;;  %v836_v8 = vpop.permute.xlu1 %835  ;;  %v834_v51 = vpop.permute.xlu0 %833  ;;  %v3485_v20 = vpack.c.bf16 %v757_v15, %v675_v48  ;;  %v4677_v48 = vrot.slane %v4275_v12, %v4512_v3  ;;  %v4681_v7 = vrot.slane %v4275_v12, %v4515_v29 }
 0x100   : > { %6032 = vst [vmem:[#allocation44_spill] sm:$0xff] %v4666_v62  ;;  %v841_v54 = vsel %vm839_vm4, %v834_v51, %v836_v8  ;;  %v842_v11 = vsel %vm839_vm4, %v4369_v4, %v834_v51  ;;  %v813_v52 = vmul.f32 %v4662_v6, %v4060_v16  ;;  %v814_v10 = vmul.f32 %v4666_v62, %v3963_v5 }
 0x101   : > { %v893_v13 = vmul.f32 %v4636_v0, %v842_v11  ;;  %v894_v21 = vmul.f32 %v4640_v25, %v841_v54  ;;  %3486 = vmatprep.subr.bf16.mxu1 %v3485_v20  ;;  %v4696_v5 = vrot.slane %v4382_v28, %v4503_v38  ;;  %v4707_v54 = vrot.slane %v4382_v28, %v4506_v9  ;;  %v6072_v0 = vld [vmem:[#allocation20_spill] sm:$0xff] }
 0x102   : > { %3488 = vmatpush1.bf16.msra.mxu1 %v3487_v47  ;;  %v4711_v11 = vrot.slane %v4380_v44, %v4503_v38 }
 0x103   : > { %v3475_v24 = vpack.c.bf16 %v893_v13, %v811_v45  ;;  %v916_v19 = vpop.permute.xlu1 %915  ;;  %v838_v4 = vpop.permute.xlu0 %837  ;;  %v3473_v51 = vpack.c.bf16 %v894_v21, %v812_v26  ;;  %6033 = vst [vmem:[#allocation45_spill] sm:$0xff] %v4696_v5  ;;  %6035 = vst [vmem:[#allocation47_spill] sm:$0xff] %v4707_v54 }
 0x104   : > { %v840_v41 = vsel %vm839_vm4, %v836_v8, %v838_v4  ;;  %v847_v15 = vsel %vm839_vm4, %v838_v4, %v4331_v35  ;;  %v4703_v35 = vrot.slane %v4380_v44, %v4506_v9  ;;  %6036 = vst [vmem:[#allocation48_spill] sm:$0xff] %v4711_v11  ;;  %v4721_v4 = vrot.slane %v4380_v44, %v4512_v3 }
 0x105   : > { %v895_v12 = vmul.f32 %v4677_v48, %v840_v41  ;;  %v896_v45 = vmul.f32 %v4681_v7, %v847_v15  ;;  %3474 = vmatprep.subr.bf16.mxu0 %v3473_v51  ;;  %v4725_v51 = vrot.slane %v4380_v44, %v4515_v29 }
 0x106   : > { %3476 = vmatpush1.bf16.msra.mxu0 %v3475_v24  ;;  %6034 = vst [vmem:[#allocation46_spill] sm:$0xff] %v4703_v35  ;;  %6037 = vst [vmem:[#allocation49_spill] sm:$0xff] %v4721_v4 }
 0x107   : > { %v3491_v47 = vpack.c.bf16 %v895_v12, %v813_v52  ;;  %v998_v16 = vpop.permute.xlu1 %997  ;;  %v918_v20 = vpop.permute.xlu0 %917  ;;  %v3489_v26 = vpack.c.bf16 %v896_v45, %v814_v10  ;;  %6038 = vst [vmem:[#allocation50_spill] sm:$0xff] %v4725_v51 }
 0x108   : > { %v1006_v8 = vsel %vm1003_vm6, %v4453_v34, %v998_v16  ;;  %v923_v13 = vsel %vm921_vm5, %v916_v19, %v918_v20  ;;  %v924_v34 = vsel %vm921_vm5, %v4426_v36, %v916_v19  ;;  %v4733_v36 = vrot.slane %v4382_v28, %v4512_v3 }
 0x109   : > { %3490 = vmatprep.subr.bf16.mxu1 %v3489_v26  ;;  %v1057_v52 = vmul.f32 %v4696_v5, %v1006_v8  ;;  %v976_v41 = vmul.f32 %v4703_v35, %v923_v13  ;;  %v4737_v19 = vrot.slane %v4382_v28, %v4515_v29  ;;  %v975_v12 = vmul.f32 %v4711_v11, %v924_v34 }
 0x10a   : > { %3492 = vmatpush1.bf16.msra.mxu1 %v3491_v47  ;;  %6039 = vst [vmem:[#allocation51_spill] sm:$0xff] %v4733_v36  ;;  %v4747_v8 = vrot.slane %v4442_v53, %v4515_v29 }
 0x10b   : > { %v920_v21 = vpop.permute.xlu1 %919  ;;  %v1000_v24 = vpop.permute.xlu0 %999  ;;  %6040 = vst [vmem:[#allocation52_spill] sm:$0xff] %v4737_v19  ;;  %v3479_v13 = vpack.c.bf16 %v1057_v52, %v975_v12 }
 0x10c   : > { %v1005_v10 = vsel %vm1003_vm6, %v998_v16, %v1000_v24  ;;  %v922_v44 = vsel %vm921_vm5, %v918_v20, %v920_v21  ;;  %v929_v45 = vsel %vm921_vm5, %v920_v21, %v4396_v27  ;;  %6041 = vst [vmem:[#allocation53_spill] sm:$0xff] %v4747_v8  ;;  %v4756_v20 = vrot.slane %v4442_v53, %v4506_v9  ;;  %v1543_v9 = vld [vmem:[%s5897_s9 + $0x88] sm:$0xff] }
 0x10d   : > { %v1058_v15 = vmul.f32 %v4707_v54, %v1005_v10  ;;  %v977_v27 = vmul.f32 %v4721_v4, %v922_v44  ;;  %v978_v21 = vmul.f32 %v4725_v51, %v929_v45  ;;  %v1527_v45 = vld [vmem:[%s5897_s9 + $0x8] sm:$0xff] }
 0x10e   : > { %6042 = vst [vmem:[#allocation54_spill] sm:$0xff] %v4756_v20 }
 0x10f   : > { %v1080_v47 = vpop.permute.xlu1 %1079  ;;  %v1002_v16 = vpop.permute.xlu0 %1001  ;;  %v3477_v26 = vpack.c.bf16 %v1058_v15, %v976_v41 }
 0x110   : > { %v1004_v28 = vsel %vm1003_vm6, %v1000_v24, %v1002_v16  ;;  %v1011_v34 = vsel %vm1003_vm6, %v1002_v16, %v4413_v50  ;;  %v4764_v24 = vrot.slane %v4442_v53, %v4503_v38  ;;  %v1542_v50 = vld [vmem:[%s5897_s9 + $0x80] sm:$0xff]  ;;  %v1088_v52 = vsel %vm1085_vm7, %v4493_v22, %v1080_v47 }
 0x111   : > { %v1059_v10 = vmul.f32 %v4733_v36, %v1004_v28  ;;  %v1060_v29 = vmul.f32 %v4737_v19, %v1011_v34  ;;  %3478 = vmatprep.subr.bf16.mxu0 %v3477_v26  ;;  %v1526_v38 = vld [vmem:[%s5897_s9] sm:$0xff]  ;;  %v4786_v26 = vrot.slane %v4442_v53, %v4512_v3  ;;  %v1575_v28 = vld [vmem:[%s5897_s9 + $0x188] sm:$0xff] }
 0x112   : > { %6043 = vst [vmem:[#allocation55_spill] sm:$0xff] %v4764_v24  ;;  %3480 = vmatpush1.bf16.msra.mxu0 %v3479_v13  ;;  %v1574_v13 = vld [vmem:[%s5897_s9 + $0x180] sm:$0xff] }
 0x113   : > { %v3495_v41 = vpack.c.bf16 %v1059_v10, %v977_v27  ;;  %v1084_v15 = vpop.permute.xlu1 %1083  ;;  %v1082_v12 = vpop.permute.xlu0 %1081  ;;  %v3493_v44 = vpack.c.bf16 %v1060_v29, %v978_v21  ;;  %6044 = vst [vmem:[#allocation56_spill] sm:$0xff] %v4786_v26  ;;  %v1558_v34 = vld [vmem:[%s5897_s9 + $0x100] sm:$0xff]  ;;  %v1559_v27 = vld [vmem:[%s5897_s9 + $0x108] sm:$0xff]  ;;  %v1544_v21 = vld [vmem:[%s5897_s9 + $0x90] sm:$0xff]  ;;  %v1139_v29 = vmul.f32 %v4764_v24, %v1088_v52 }
 0x114   : > { %v1093_v16 = vsel %vm1085_vm7, %v1084_v15, %v4471_v55  ;;  %v1087_v22 = vsel %vm1085_vm7, %v1080_v47, %v1082_v12  ;;  %v1086_v53 = vsel %vm1085_vm7, %v1082_v12, %v1084_v15  ;;  %v3497_v47 = vpack.c.bf16 %v1543_v9, %v1542_v50  ;;  %v1545_v10 = vld [vmem:[%s5897_s9 + $0x98] sm:$0xff]  ;;  %v1576_v50 = vld [vmem:[%s5897_s9 + $0x190] sm:$0xff]  ;;  %v1934_v24 = vld [vmem:[%s5891_s3] sm:$0x3] }
 0x115   : > { %v1142_v55 = vmul.f32 %v4747_v8, %v1093_v16  ;;  %v1140_v3 = vmul.f32 %v4756_v20, %v1087_v22  ;;  %3494 = vmatprep.subr.bf16.mxu1 %v3493_v44  ;;  %v3499_v15 = vpack.c.bf16 %v1527_v45, %v1526_v38  ;;  %v1577_v9 = vld [vmem:[%s5897_s9 + $0x198] sm:$0xff]  ;;  %v3529_v12 = vpack.c.bf16 %v1575_v28, %v1574_v13  ;;  %v1528_v44 = vld [vmem:[%s5897_s9 + $0x10] sm:$0xff]  ;;  %v1546_v16 = vld [vmem:[%s5897_s9 + $0xa0] sm:$0xff] }
 0x116   : > { %3496 = vmatpush1.bf16.msra.mxu1 %v3495_v41  ;;  %v1529_v52 = vld [vmem:[%s5897_s9 + $0x18] sm:$0xff]  ;;  %v1141_v41 = vmul.f32 %v4786_v26, %v1086_v53  ;;  %v3531_v38 = vpack.c.bf16 %v1559_v27, %v1558_v34  ;;  %v3501_v45 = vpack.c.bf16 %v1545_v10, %v1544_v21  ;;  %v1547_v22 = vld [vmem:[%s5897_s9 + $0xa8] sm:$0xff]  ;;  %v3533_v13 = vpack.c.bf16 %v1577_v9, %v1576_v50  ;;  %v1560_v28 = vld [vmem:[%s5897_s9 + $0x110] sm:$0xff] }
 0x117   : > { %1392 = vmatprep.subr.mxu0 %v1140_v3  ;;  %1463 = vmatprep.subr.mxu1 %v1142_v55  ;;  %v1561_v34 = vld [vmem:[%s5897_s9 + $0x118] sm:$0xff]  ;;  %v3503_v55 = vpack.c.bf16 %v1529_v52, %v1528_v44  ;;  %v1578_v53 = vld [vmem:[%s5897_s9 + $0x1a0] sm:$0xff]  ;;  %v1579_v3 = vld [vmem:[%s5897_s9 + $0x1a8] sm:$0xff] }
 0x118   : > { %1393 = vmatpush1.msra.mxu0 %v1139_v29  ;;  %v1530_v27 = vld [vmem:[%s5897_s9 + $0x20] sm:$0xff]  ;;  %v1531_v21 = vld [vmem:[%s5897_s9 + $0x28] sm:$0xff]  ;;  %v3535_v10 = vpack.c.bf16 %v1561_v34, %v1560_v28  ;;  %v1548_v29 = vld [vmem:[%s5897_s9 + $0xb0] sm:$0xff] }
 0x119   : > { %3251 = vmatmul.mubr.msk.f32.vlgmr.msra.gmra.mrb[2].mxu0 %vm1230_vm8, %v4491_v61  ;;  %3498 = vmatprep.subr.bf16.mxu0 %v3497_v47  ;;  %v3505_v47 = vpack.c.bf16 %v1547_v22, %v1546_v16  ;;  %v1562_v50 = vld [vmem:[%s5897_s9 + $0x120] sm:$0xff]  ;;  %v1563_v9 = vld [vmem:[%s5897_s9 + $0x128] sm:$0xff]  ;;  %v1580_v44 = vld [vmem:[%s5897_s9 + $0x1b0] sm:$0xff] }
 0x11a   : > { %1464 = vmatpush1.msra.mxu1 %v1141_v41  ;;  %3500 = vmatpush3.bf16.msra.mxu0 %v3499_v15  ;;  %v3537_v15 = vpack.c.bf16 %v1579_v3, %v1578_v53  ;;  %v1581_v52 = vld [vmem:[%s5897_s9 + $0x1b8] sm:$0xff]  ;;  %v3539_v16 = vpack.c.bf16 %v1563_v9, %v1562_v50  ;;  %v1550_v22 = vld [vmem:[%s5897_s9 + $0xc0] sm:$0xff]  ;;  %v1564_v34 = vld [vmem:[%s5897_s9 + $0x130] sm:$0xff] }
 0x11b   : > { %3252 = vmatmul.mubr.msk.f32.vlgmr.msra.gmra.mrb[2].mxu1 %vm1230_vm8, %v4491_v61  ;;  %3530 = vmatprep.subr.bf16.mxu1 %v3529_v12  ;;  %v1549_v61 = vld [vmem:[%s5897_s9 + $0xb8] sm:$0xff]  ;;  %v3507_v12 = vpack.c.bf16 %v1531_v21, %v1530_v27  ;;  %v3541_v28 = vpack.c.bf16 %v1581_v52, %v1580_v44  ;;  %v1582_v3 = vld [vmem:[%s5897_s9 + $0x1c0] sm:$0xff]  ;;  %v1584_v52 = vld [vmem:[%s5897_s9 + $0x1d0] sm:$0xff] }
 0x11c   : > { %3532 = vmatpush3.bf16.msra.mxu1 %v3531_v38  ;;  %3502 = vmatprep.subr.bf16.mxu0 %v3501_v45  ;;  %v3509_v41 = vpack.c.bf16 %v1549_v61, %v1548_v29  ;;  %v1532_v38 = vld [vmem:[%s5897_s9 + $0x30] sm:$0xff]  ;;  %v1533_v45 = vld [vmem:[%s5897_s9 + $0x38] sm:$0xff]  ;;  %v1534_v21 = vld [vmem:[%s5897_s9 + $0x40] sm:$0xff] }
 0x11d   : > { %3534 = vmatprep.subr.bf16.mxu1 %v3533_v13  ;;  %v1551_v13 = vld [vmem:[%s5897_s9 + $0xc8] sm:$0xff]  ;;  %v3511_v53 = vpack.c.bf16 %v1533_v45, %v1532_v38  ;;  %v1552_v61 = vld [vmem:[%s5897_s9 + $0xd0] sm:$0xff]  ;;  %v1566_v9 = vld [vmem:[%s5897_s9 + $0x140] sm:$0xff] }
 0x11e   : > { %3504 = vmatpush3.bf16.msra.mxu0 %v3503_v55  ;;  %v1565_v55 = vld [vmem:[%s5897_s9 + $0x138] sm:$0xff]  ;;  %v3513_v27 = vpack.c.bf16 %v1551_v13, %v1550_v22  ;;  %v1536_v45 = vld [vmem:[%s5897_s9 + $0x50] sm:$0xff]  ;;  %v1554_v13 = vld [vmem:[%s5897_s9 + $0xe0] sm:$0xff] }
 0x11f   : > { %3506 = vmatprep.subr.bf16.mxu0 %v3505_v47  ;;  %v1583_v47 = vld [vmem:[%s5897_s9 + $0x1c8] sm:$0xff]  ;;  %v3543_v29 = vpack.c.bf16 %v1565_v55, %v1564_v34  ;;  %v1568_v55 = vld [vmem:[%s5897_s9 + $0x150] sm:$0xff] }
 0x120   : > { %3536 = vmatpush3.bf16.msra.mxu1 %v3535_v10  ;;  %v1535_v10 = vld [vmem:[%s5897_s9 + $0x48] sm:$0xff]  ;;  %v3545_v50 = vpack.c.bf16 %v1583_v47, %v1582_v3  ;;  %v1586_v47 = vld [vmem:[%s5897_s9 + $0x1e0] sm:$0xff] }
 0x121   : > { %3538 = vmatprep.subr.bf16.mxu1 %v3537_v15  ;;  %v1553_v15 = vld [vmem:[%s5897_s9 + $0xd8] sm:$0xff]  ;;  %v3515_v44 = vpack.c.bf16 %v1535_v10, %v1534_v21 }
 0x122   : > { %3508 = vmatpush3.bf16.msra.mxu0 %v3507_v12  ;;  %v1567_v12 = vld [vmem:[%s5897_s9 + $0x148] sm:$0xff]  ;;  %v3517_v38 = vpack.c.bf16 %v1553_v15, %v1552_v61  ;;  %v1538_v61 = vld [vmem:[%s5897_s9 + $0x60] sm:$0xff] }
 0x123   : > { %3510 = vmatprep.subr.bf16.mxu0 %v3509_v41  ;;  %v1585_v41 = vld [vmem:[%s5897_s9 + $0x1d8] sm:$0xff]  ;;  %v3547_v22 = vpack.c.bf16 %v1567_v12, %v1566_v9  ;;  %v1539_v15 = vld [vmem:[%s5897_s9 + $0x68] sm:$0xff] }
 0x124   : > { %3540 = vmatpush3.bf16.msra.mxu1 %v3539_v16  ;;  %v1537_v16 = vld [vmem:[%s5897_s9 + $0x58] sm:$0xff]  ;;  %v3549_v34 = vpack.c.bf16 %v1585_v41, %v1584_v52  ;;  %v3523_v9 = vpack.c.bf16 %v1539_v15, %v1538_v61  ;;  %v1571_v12 = vld [vmem:[%s5897_s9 + $0x168] sm:$0xff]  ;;  %v4992_v15 = vpop.permute.xlu0 %1227 }
 0x125   : > { %3542 = vmatprep.subr.bf16.mxu1 %v3541_v28  ;;  %v1555_v28 = vld [vmem:[%s5897_s9 + $0xe8] sm:$0xff]  ;;  %v3519_v3 = vpack.c.bf16 %v1537_v16, %v1536_v45  ;;  %v1557_v52 = vld [vmem:[%s5897_s9 + $0xf8] sm:$0xff]  ;;  %v1588_v45 = vld [vmem:[%s5897_s9 + $0x1f0] sm:$0xff] }
 0x126   : > { %3512 = vmatpush3.bf16.msra.mxu0 %v3511_v53  ;;  %v1569_v53 = vld [vmem:[%s5897_s9 + $0x158] sm:$0xff]  ;;  %v3521_v21 = vpack.c.bf16 %v1555_v28, %v1554_v13 }
 0x127   : > { %3514 = vmatprep.subr.bf16.mxu0 %v3513_v27  ;;  %v1587_v27 = vld [vmem:[%s5897_s9 + $0x1e8] sm:$0xff]  ;;  %v3551_v10 = vpack.c.bf16 %v1569_v53, %v1568_v55  ;;  %v1589_v16 = vld [vmem:[%s5897_s9 + $0x1f8] sm:$0xff] }
 0x128   : > { %3544 = vmatpush3.bf16.msra.mxu1 %v3543_v29  ;;  %v3553_v29 = vpack.c.bf16 %v1587_v27, %v1586_v47  ;;  %v3557_v13 = vpack.c.bf16 %v1589_v16, %v1588_v45  ;;  %v1541_v28 = vld [vmem:[%s5897_s9 + $0x78] sm:$0xff]  ;;  %v1606_v47 = vld [vmem:[%s5897_s9 + $0x280] sm:$0xff]  ;;  %v1607_v27 = vld [vmem:[%s5897_s9 + $0x288] sm:$0xff] }
 0x129   : > { %3546 = vmatprep.subr.bf16.mxu1 %v3545_v50  ;;  %v1570_v50 = vld [vmem:[%s5897_s9 + $0x160] sm:$0xff]  ;;  %v1573_v55 = vld [vmem:[%s5897_s9 + $0x178] sm:$0xff] }
 0x12a   : > { %3516 = vmatpush3.bf16.msra.mxu0 %v3515_v44  ;;  %v1556_v44 = vld [vmem:[%s5897_s9 + $0xf0] sm:$0xff]  ;;  %v3555_v41 = vpack.c.bf16 %v1571_v12, %v1570_v50  ;;  %v1609_v45 = vld [vmem:[%s5897_s9 + $0x298] sm:$0xff] }
 0x12b   : > { %3518 = vmatprep.subr.bf16.mxu0 %v3517_v38  ;;  %v3525_v38 = vpack.c.bf16 %v1557_v52, %v1556_v44  ;;  %v1590_v44 = vld [vmem:[%s5897_s9 + $0x200] sm:$0xff]  ;;  %v1591_v52 = vld [vmem:[%s5897_s9 + $0x208] sm:$0xff] }
 0x12c   : > { %3548 = vmatpush3.bf16.msra.mxu1 %v3547_v22  ;;  %v1540_v22 = vld [vmem:[%s5897_s9 + $0x70] sm:$0xff] }
 0x12d   : > { %3550 = vmatprep.subr.bf16.mxu1 %v3549_v34  ;;  %v1572_v34 = vld [vmem:[%s5897_s9 + $0x170] sm:$0xff]  ;;  %v3527_v53 = vpack.c.bf16 %v1541_v28, %v1540_v22  ;;  %v3563_v28 = vpack.c.bf16 %v1591_v52, %v1590_v44 }
 0x12e   : > { %3520 = vmatpush3.bf16.msra.mxu0 %v3519_v3  ;;  %v3559_v3 = vpack.c.bf16 %v1573_v55, %v1572_v34  ;;  %v1622_v34 = vld [vmem:[%s5897_s9 + $0x300] sm:$0xff]  ;;  %v1623_v55 = vld [vmem:[%s5897_s9 + $0x308] sm:$0xff] }
 0x12f   : > { %3522 = vmatprep.subr.bf16.mxu0 %v3521_v21  ;;  %v3561_v21 = vpack.c.bf16 %v1607_v27, %v1606_v47  ;;  %v1592_v27 = vld [vmem:[%s5897_s9 + $0x210] sm:$0xff] }
 0x130   : > { %3552 = vmatpush3.bf16.msra.mxu1 %v3551_v10  ;;  %v1638_v10 = vld [vmem:[%s5897_s9 + $0x380] sm:$0xff] }
 0x131   : > { %3554 = vmatprep.subr.bf16.mxu1 %v3553_v29  ;;  %v1639_v29 = vld [vmem:[%s5897_s9 + $0x388] sm:$0xff] }
 0x132   : > { %3524 = vmatpush3.bf16.msra.mxu0 %v3523_v9  ;;  %v3593_v61 = vpack.c.bf16 %v1639_v29, %v1638_v10  ;;  %v1640_v10 = vld [vmem:[%s5897_s9 + $0x390] sm:$0xff] }
 0x133   : > { %3526 = vmatprep.subr.bf16.mxu0 %v3525_v38  ;;  %v1608_v38 = vld [vmem:[%s5897_s9 + $0x290] sm:$0xff] }
 0x134   : > { %3556 = vmatpush3.bf16.msra.mxu1 %v3555_v41  ;;  %v3565_v47 = vpack.c.bf16 %v1609_v45, %v1608_v38  ;;  %v3595_v38 = vpack.c.bf16 %v1623_v55, %v1622_v34  ;;  %v1642_v34 = vld [vmem:[%s5897_s9 + $0x3a0] sm:$0xff]  ;;  %v1643_v55 = vld [vmem:[%s5897_s9 + $0x3a8] sm:$0xff] }
 0x135   : > { %3558 = vmatprep.subr.bf16.mxu1 %v3557_v13 }
 0x136   : > { %3528 = vmatpush3.bf16.msra.mxu0 %v3527_v53 }
 0x137   : > { %3562 = vmatprep.subr.bf16.mxu0 %v3561_v21  ;;  %v1593_v21 = vld [vmem:[%s5897_s9 + $0x218] sm:$0xff] }
 0x138   : > { %3560 = vmatpush3.bf16.msra.mxu1 %v3559_v3  ;;  %v3567_v45 = vpack.c.bf16 %v1593_v21, %v1592_v27  ;;  %v1613_v27 = vld [vmem:[%s5897_s9 + $0x2b8] sm:$0xff] }
 0x139   : > { %3594 = vmatprep.subr.bf16.mxu1 %v3593_v61  ;;  %v1641_v61 = vld [vmem:[%s5897_s9 + $0x398] sm:$0xff] }
 0x1b8   : > { %v1300_v50 = vpop.f32.mrb[0].mxu0 }
 0x1b9   : > { %v1302_v9 = vpop.f32.mrb[1].mxu0  ;;  %v4995_v12 = vadd.f32 %v1300_v50, %v4992_v15  ;;  %v1610_v50 = vld [vmem:[%s5897_s9 + $0x2a0] sm:$0xff] }
 0x1ba   : > { %v5004_v41 = vadd.f32 %v1302_v9, %v4992_v15  ;;  %v1611_v9 = vld [vmem:[%s5897_s9 + $0x2a8] sm:$0xff] }
 0x1bb   : > { %v5953_v16 = vmax.f32 %v4995_v12, 0.0  ;;  %v3569_v26 = vpack.c.bf16 %v1611_v9, %v1610_v50  ;;  %v1627_v50 = vld [vmem:[%s5897_s9 + $0x328] sm:$0xff]  ;;  %v3601_v9 = vpack.c.bf16 %v1643_v55, %v1642_v34  ;;  %v1629_v34 = vld [vmem:[%s5897_s9 + $0x338] sm:$0xff] }
 0x1bc   : > { %v1371_v22 = vpop.f32.mrb[0].mxu1  ;;  %v5951_v13 = vmax.f32 %v5004_v41, 0.0 }
 0x1bd   : > { %v1373_v53 = vpop.f32.mrb[1].mxu1  ;;  %v5021_v3 = vadd.f32 %v1371_v22, %v4992_v15  ;;  %v1624_v22 = vld [vmem:[%s5897_s9 + $0x310] sm:$0xff] }
 0x1be   : > { %1718 = vmatprep.mubr.f32.mxu0 %v5951_v13  ;;  %v5035_v29 = vadd.f32 %v1373_v53, %v4992_v15  ;;  %v1625_v53 = vld [vmem:[%s5897_s9 + $0x318] sm:$0xff]  ;;  %v3597_v13 = vpack.c.bf16 %v1641_v61, %v1640_v10  ;;  %v1626_v61 = vld [vmem:[%s5897_s9 + $0x320] sm:$0xff] }
 0x1bf   : > { %1719 = vmatmul.mubr.f32.vlgmr.msra.gmra.mrb[4].mxu0 %v5953_v16  ;;  %v5955_v44 = vmax.f32 %v5021_v3, 0.0  ;;  %v1594_v16 = vld [vmem:[%s5897_s9 + $0x220] sm:$0xff]  ;;  %v3599_v21 = vpack.c.bf16 %v1625_v53, %v1624_v22  ;;  %v3603_v22 = vpack.c.bf16 %v1627_v50, %v1626_v61  ;;  %v1617_v61 = vld [vmem:[%s5897_s9 + $0x2d8] sm:$0xff] }
 0x1c0   : > { %v5954_v52 = vmax.f32 %v5035_v29, 0.0  ;;  %3564 = vmatpush3.bf16.msra.mxu0 %v3563_v28  ;;  %v1595_v28 = vld [vmem:[%s5897_s9 + $0x228] sm:$0xff] }
 0x1c1   : > { %3566 = vmatprep.subr.bf16.mxu0 %v3565_v47  ;;  %v1612_v47 = vld [vmem:[%s5897_s9 + $0x2b0] sm:$0xff]  ;;  %v3571_v10 = vpack.c.bf16 %v1595_v28, %v1594_v16  ;;  %v1597_v16 = vld [vmem:[%s5897_s9 + $0x238] sm:$0xff] }
 0x1c2   : > { %1788 = vmatprep.mubr.f32.mxu1 %v5954_v52  ;;  %v3573_v52 = vpack.c.bf16 %v1613_v27, %v1612_v47  ;;  %v1628_v28 = vld [vmem:[%s5897_s9 + $0x330] sm:$0xff]  ;;  %v1598_v27 = vld [vmem:[%s5897_s9 + $0x240] sm:$0xff] }
 0x1c3   : > { %1789 = vmatmul.mubr.f32.vlgmr.msra.gmra.mrb[4].mxu1 %v5955_v44  ;;  %v1596_v44 = vld [vmem:[%s5897_s9 + $0x230] sm:$0xff]  ;;  %v3607_v50 = vpack.c.bf16 %v1629_v34, %v1628_v28  ;;  %v1649_v28 = vld [vmem:[%s5897_s9 + $0x3d8] sm:$0xff]  ;;  %v1618_v34 = vld [vmem:[%s5897_s9 + $0x2e0] sm:$0xff] }
 0x1c4   : > { %3596 = vmatpush3.bf16.msra.mxu1 %v3595_v38  ;;  %3568 = vmatpush3.bf16.msra.mxu0 %v3567_v45  ;;  %v1644_v38 = vld [vmem:[%s5897_s9 + $0x3b0] sm:$0xff]  ;;  %v1645_v45 = vld [vmem:[%s5897_s9 + $0x3b8] sm:$0xff]  ;;  %v3575_v53 = vpack.c.bf16 %v1597_v16, %v1596_v44  ;;  %v1599_v44 = vld [vmem:[%s5897_s9 + $0x248] sm:$0xff] }
 0x1c5   : > { %3598 = vmatprep.subr.bf16.mxu1 %v3597_v13  ;;  %3570 = vmatprep.subr.bf16.mxu0 %v3569_v26  ;;  %v1614_v26 = vld [vmem:[%s5897_s9 + $0x2c0] sm:$0xff]  ;;  %v1615_v13 = vld [vmem:[%s5897_s9 + $0x2c8] sm:$0xff]  ;;  %v3605_v55 = vpack.c.bf16 %v1645_v45, %v1644_v38 }
 0x1c6   : > { %v3577_v47 = vpack.c.bf16 %v1615_v13, %v1614_v26  ;;  %v1630_v16 = vld [vmem:[%s5897_s9 + $0x340] sm:$0xff]  ;;  %v1631_v38 = vld [vmem:[%s5897_s9 + $0x348] sm:$0xff]  ;;  %v1600_v13 = vld [vmem:[%s5897_s9 + $0x250] sm:$0xff] }
 0x1c8   : > { %3600 = vmatpush3.bf16.msra.mxu1 %v3599_v21  ;;  %3572 = vmatpush3.bf16.msra.mxu0 %v3571_v10  ;;  %v1646_v21 = vld [vmem:[%s5897_s9 + $0x3c0] sm:$0xff]  ;;  %v1647_v10 = vld [vmem:[%s5897_s9 + $0x3c8] sm:$0xff] }
 0x1c9   : > { %3602 = vmatprep.subr.bf16.mxu1 %v3601_v9  ;;  %3574 = vmatprep.subr.bf16.mxu0 %v3573_v52  ;;  %v1616_v52 = vld [vmem:[%s5897_s9 + $0x2d0] sm:$0xff]  ;;  %v3579_v9 = vpack.c.bf16 %v1599_v44, %v1598_v27  ;;  %v3609_v45 = vpack.c.bf16 %v1647_v10, %v1646_v21  ;;  %v1633_v21 = vld [vmem:[%s5897_s9 + $0x358] sm:$0xff] }
 0x1ca   : > { %v3581_v26 = vpack.c.bf16 %v1617_v61, %v1616_v52  ;;  %v1632_v44 = vld [vmem:[%s5897_s9 + $0x350] sm:$0xff]  ;;  %v1602_v61 = vld [vmem:[%s5897_s9 + $0x260] sm:$0xff] }
 0x1cc   : > { %3604 = vmatpush3.bf16.msra.mxu1 %v3603_v22  ;;  %3576 = vmatpush3.bf16.msra.mxu0 %v3575_v53  ;;  %v1601_v22 = vld [vmem:[%s5897_s9 + $0x258] sm:$0xff]  ;;  %v1648_v53 = vld [vmem:[%s5897_s9 + $0x3d0] sm:$0xff] }
 0x1cd   : > { %3606 = vmatprep.subr.bf16.mxu1 %v3605_v55  ;;  %3578 = vmatprep.subr.bf16.mxu0 %v3577_v47  ;;  %v1619_v55 = vld [vmem:[%s5897_s9 + $0x2e8] sm:$0xff]  ;;  %v3611_v47 = vpack.c.bf16 %v1631_v38, %v1630_v16  ;;  %v3583_v27 = vpack.c.bf16 %v1601_v22, %v1600_v13  ;;  %v3613_v10 = vpack.c.bf16 %v1649_v28, %v1648_v53  ;;  %v1620_v38 = vld [vmem:[%s5897_s9 + $0x2f0] sm:$0xff]  ;;  %v1634_v22 = vld [vmem:[%s5897_s9 + $0x360] sm:$0xff] }
 0x1ce   : > { %v3585_v52 = vpack.c.bf16 %v1619_v55, %v1618_v34  ;;  %v1651_v16 = vld [vmem:[%s5897_s9 + $0x3e8] sm:$0xff]  ;;  %v1604_v55 = vld [vmem:[%s5897_s9 + $0x270] sm:$0xff] }
 0x1cf   : > { %v1635_v28 = vld [vmem:[%s5897_s9 + $0x368] sm:$0xff] }
 0x1d0   : > { %3608 = vmatpush3.bf16.msra.mxu1 %v3607_v50  ;;  %3580 = vmatpush3.bf16.msra.mxu0 %v3579_v9  ;;  %v1603_v50 = vld [vmem:[%s5897_s9 + $0x268] sm:$0xff]  ;;  %v1650_v9 = vld [vmem:[%s5897_s9 + $0x3e0] sm:$0xff] }
 0x1d1   : > { %3610 = vmatprep.subr.bf16.mxu1 %v3609_v45  ;;  %3582 = vmatprep.subr.bf16.mxu0 %v3581_v26  ;;  %v1621_v45 = vld [vmem:[%s5897_s9 + $0x2f8] sm:$0xff]  ;;  %v3615_v26 = vpack.c.bf16 %v1633_v21, %v1632_v44  ;;  %v3587_v13 = vpack.c.bf16 %v1603_v50, %v1602_v61  ;;  %v3617_v53 = vpack.c.bf16 %v1651_v16, %v1650_v9  ;;  %v1636_v61 = vld [vmem:[%s5897_s9 + $0x370] sm:$0xff] }
 0x1d2   : > { %v3589_v34 = vpack.c.bf16 %v1621_v45, %v1620_v38  ;;  %v1653_v44 = vld [vmem:[%s5897_s9 + $0x3f8] sm:$0xff]  ;;  %v3619_v21 = vpack.c.bf16 %v1635_v28, %v1634_v22 }
 0x1d3   : > { %v1637_v50 = vld [vmem:[%s5897_s9 + $0x378] sm:$0xff] }
 0x1d4   : > { %3612 = vmatpush3.bf16.msra.mxu1 %v3611_v47  ;;  %3584 = vmatpush3.bf16.msra.mxu0 %v3583_v27  ;;  %v1605_v47 = vld [vmem:[%s5897_s9 + $0x278] sm:$0xff]  ;;  %v1652_v27 = vld [vmem:[%s5897_s9 + $0x3f0] sm:$0xff]  ;;  %v3623_v9 = vpack.c.bf16 %v1637_v50, %v1636_v61 }
 0x1d5   : > { %3614 = vmatprep.subr.bf16.mxu1 %v3613_v10  ;;  %3586 = vmatprep.subr.bf16.mxu0 %v3585_v52  ;;  %v3591_v10 = vpack.c.bf16 %v1605_v47, %v1604_v55  ;;  %v3621_v52 = vpack.c.bf16 %v1653_v44, %v1652_v27  ;;  %v2017_v44 = vld [vmem:[%s5894_s6] sm:$0xff] }
 0x1d8   : > { %3616 = vmatpush3.bf16.msra.mxu1 %v3615_v26  ;;  %3588 = vmatpush3.bf16.msra.mxu0 %v3587_v13 }
 0x1d9   : > { %3618 = vmatprep.subr.bf16.mxu1 %v3617_v53  ;;  %3590 = vmatprep.subr.bf16.mxu0 %v3589_v34 }
 0x1dc   : > { %3620 = vmatpush3.bf16.msra.mxu1 %v3619_v21  ;;  %3592 = vmatpush3.bf16.msra.mxu0 %v3591_v10 }
 0x1dd   : > { %3622 = vmatprep.subr.bf16.mxu1 %v3621_v52  ;;  %3423 = vmatprep.subr.mxu0 %v6023_v60 }
 0x1e0   : > { %3624 = vmatpush3.bf16.msra.mxu1 %v3623_v9 }
 0x1e1   : > { %3428 = vmatprep.subr.mxu1 %v6023_v60 }
 0x1ec   : > { %v1442_v16 = vpop.f32.mrb[2].mxu0 }
 0x1ed   : > { %v5201_v38 = vadd.f32 %v1442_v16, %v4992_v15  ;;  %v1444_v45 = vpop.f32.mrb[3].mxu0 }
 0x1ee   : > { %v5204_v26 = vadd.f32 %v1444_v45, %v4992_v15  ;;  %v1513_v13 = vpop.f32.mrb[2].mxu1 }
 0x1ef   : > { %v5207_v22 = vadd.f32 %v1513_v13, %v4992_v15  ;;  %v1515_v53 = vpop.f32.mrb[3].mxu1  ;;  %v5959_v55 = vmax.f32 %v5201_v38, 0.0 }
 0x1f0   : > { %v5956_v28 = vmax.f32 %v5204_v26, 0.0  ;;  %v5211_v34 = vadd.f32 %v1515_v53, %v4992_v15  ;;  %v1935_v15 = vld [vmem:[%s5892_s4] sm:$0x3] }
 0x1f1   : > { %v5958_v27 = vmax.f32 %v5207_v22, 0.0  ;;  %1938 = vperm.xlu1 %3740, %v1935_v15  }
 0x1f2   : > { %v5957_v47 = vmax.f32 %v5211_v34, 0.0  ;;  %1858 = vmatprep.mubr.f32.mxu0 %v5956_v28 }
 0x1f3   : > { %1859 = vmatmul.mubr.f32.vlgmr.msra.gmra.mrb[6].mxu0 %v5959_v55 }
 0x1f4   : > { %1928 = vmatprep.mubr.f32.mxu1 %v5957_v47  ;;  %3425 = vmatprep.mubr.msk.f32.mxu0 %vm3831_vm9, %v6023_v60 }
 0x1f5   : > { %1929 = vmatmul.mubr.f32.vlgmr.msra.gmra.mrb[6].mxu1 %v5958_v27  ;;  %2020 = vperm.xlu1 %3740, %v2017_v44  }
 0x1f6   : > { %3430 = vmatprep.mubr.msk.f32.mxu1 %vm3831_vm9, %v6023_v60 }
 0x270   : > { %v1939_v44 = vpop.permute.xlu1 %1938 }
 0x292   : > { %v3311_v21 = vpop.f32.mrb[4].mxu0 }
 0x293   : > { %v3312_v10 = vpop.f32.mrb[5].mxu0 }
 0x294   : > { %v3313_v52 = vadd.f32 %v3312_v10, %v3311_v21 }
 0x296   : > { %v3346_v61 = vpop.f32.mrb[4].mxu1 }
 0x297   : > { %v3347_v50 = vpop.f32.mrb[5].mxu1 }
 0x298   : > { %v3348_v9 = vadd.f32 %v3347_v50, %v3346_v61  ;;  %v2109_v50 = vld [vmem:[%s5898_s10 + $0x10] sm:$0xff] }
 0x29a   : > { %v1791_v16 = vadd.f32 %v3348_v9, %v3313_v52  ;;  %v2110_v9 = vld [vmem:[%s5898_s10 + $0x18] sm:$0xff] }
 0x2c6   : > { %v3381_v45 = vpop.f32.mrb[6].mxu0 }
 0x2c7   : > { %v3382_v13 = vpop.f32.mrb[7].mxu0 }
 0x2c8   : > { %v3383_v53 = vadd.f32 %v3382_v13, %v3381_v45  ;;  %v3416_v28 = vpop.f32.mrb[6].mxu1  ;;  %v2118_v45 = vcombine.high %v2110_v9, %v2110_v9  ;;  %v2021_v13 = vpop.permute.xlu1 %2020 }
 0x2c9   : > { %v3417_v47 = vpop.f32.mrb[7].mxu1 }
 0x2ca   : > { %v1861_v27 = vadd.f32 %v3383_v53, %v1791_v16  ;;  %v3418_v55 = vadd.f32 %v3417_v47, %v3416_v28  ;;  %v2016_v28 = vld [vmem:[%s5893_s5] sm:$0xff]  ;;  %v2117_v16 = vcombine.high %v2109_v50, %v2109_v50 }
 0x2cc   : > { %v1931_v15 = vadd.f32 %v3418_v55, %v1861_v27  ;;  %v2108_v55 = vld [vmem:[%s5898_s10 + $0x8] sm:$0xff] }
 0x2cd   : > { %v2116_v27 = vcombine.high %v2108_v55, %v2108_v55 }
 0x2ce   : > { %3424 = vmatpush3.msra.mxu0 %v1931_v15 }
 0x2cf   : > { %3426 = vmatmul.mubr.msk.f32.vlgmr.msra.gmra.mrb[8].mxu0 %vm1941_vm10, %v1934_v24  ;;  %v2107_v24 = vld [vmem:[%s5898_s10] sm:$0xff] }
 0x2d0   : > { %2204 = vmatprep.mubr.f32.mxu0 %v6023_v60  ;;  %v2115_v47 = vcombine.high %v2107_v24, %v2107_v24 }
 0x2d2   : > { %3256 = vmatprep.subr.msk.mxu0 %vm2123_vm13, %v2115_v47  ;;  %v6045_v47 = vmax.f32 %v4995_v12, 0.0  ;;  %v6051_v12 = vmax.f32 %v5004_v41, 0.0  ;;  %v6055_v41 = vmax.f32 %v5201_v38, 0.0  ;;  %v6057_v38 = vmax.f32 %v5207_v22, 0.0 }
 0x2d3   : > { %3257 = vmatpush1.msk.msra.mxu0 %vm2123_vm13, %v2107_v24  ;;  %v6058_v22 = vmax.f32 %v5211_v34, 0.0  ;;  %v6060_v34 = vmax.f32 %v5204_v26, 0.0 }
 0x2d4   : > { %3262 = vmatprep.subr.msk.mxu0 %vm2123_vm13, %v2117_v16 }
 0x3a2   : > { %v2011_v21 = vpop.f32.mrb[8].mxu0 }
 0x3a3   : > { %v2012_v10 = vadd.f32 %v2011_v21, %v1939_v44  ;;  %v3427_v52 = vpop.f32.mrb[9].mxu0 }
 0x3a5   : > { %v2015_v61 = vmax.f32 %v2012_v10, 0.0 }
 0x3a7   : > { %3429 = vmatpush3.msk.msra.mxu1 %vm2027_vm11, %v2015_v61 }
 0x3a8   : > { %3431 = vmatmul.mubr.msk.f32.vlgmr.msra.gmra.mrb[8].mxu1 %vm2023_vm12, %v2016_v28  ;;  %3259 = vmatprep.subr.msk.mxu1 %vm2123_vm13, %v2116_v27 }
 0x3a9   : > { %2275 = vmatprep.mubr.f32.mxu1 %v6023_v60  ;;  %3260 = vmatpush1.msk.msra.mxu1 %vm2123_vm13, %v2108_v55 }
 0x3aa   : > { %3265 = vmatprep.subr.msk.mxu1 %vm2123_vm13, %v2118_v45 }
 0x47b   : > { %v2097_v53 = vpop.f32.mrb[8].mxu1 }
 0x47c   : > { %v2098_v15 = vadd.f32 %v2097_v53, %v2021_v13  ;;  %v3432_v44 = vpop.f32.mrb[9].mxu1 }
 0x47e   : > { %v2101_v21 = vsub.f32 0.0, %v2098_v15 }
 0x480   : > { %v2102_v10 = vmul.f32 1.442695, %v2101_v21  ;;  %v6052_v21 = vmax.f32 %v5035_v29, 0.0 }
 0x482   : > { %3745 = vpow2.f32 %v2102_v10 }
 0x48c   : > { %v3746_v52 = vpop.eup %3745 }
 0x48d   : > { %v2104_v61 = vadd.f32 1.0, %v3746_v52 }
 0x48f   : > { %3747 = vrcp.f32 %v2104_v61 }
 0x499   : > { %v3748_v28 = vpop.eup %3747 }
 0x49a   : > { %3258 = vmatmul.mubr.msk.f32.vlgmr.msra.gmra.mrb[10].mxu0 %vm2119_vm14, %v3748_v28  ;;  %3261 = vmatmul.mubr.msk.f32.vlgmr.msra.gmra.mrb[10].mxu1 %vm2119_vm14, %v3748_v28 }
 0x49b   : > { %3263 = vmatpush1.msk.msra.mxu0 %vm2123_vm13, %v2109_v50  ;;  %2346 = vmatprep.mubr.f32.mxu0 %v6023_v60  ;;  %v6046_v50 = vmax.f32 %v5021_v3, 0.0 }
 0x49c   : > { %3266 = vmatpush1.msk.msra.mxu1 %vm2123_vm13, %v2110_v9  ;;  %2417 = vmatprep.mubr.f32.mxu1 %v6023_v60 }
 0x49e   : > { %3264 = vmatmul.mubr.msk.f32.vlgmr.msra.gmra.mrb[12].mxu0 %vm2119_vm14, %v3748_v28  ;;  %3267 = vmatmul.mubr.msk.f32.vlgmr.msra.gmra.mrb[12].mxu1 %vm2119_vm14, %v3748_v28 }
 0x49f   : > { %2979 = vmatprep.mubr.f32.mxu1 %v6023_v60  ;;  %2908 = vmatprep.mubr.f32.mxu0 %v6023_v60 }
 0x56d   : > { %v2206_v24 = vpop.f32.mrb[10].mxu0  ;;  %v2277_v55 = vpop.f32.mrb[10].mxu1 }
 0x56e   : > { %v5266_v27 = vmul.f32 %v2206_v24, %v6045_v47  ;;  %v5270_v16 = vmul.f32 %v2277_v55, %v6046_v50  ;;  %v2208_v45 = vpop.f32.mrb[11].mxu0  ;;  %v2279_v9 = vpop.f32.mrb[11].mxu1 }
 0x56f   : > { %v5286_v3 = vmul.f32 %v2208_v45, %v6051_v12  ;;  %v5294_v10 = vmul.f32 %v2279_v9, %v6052_v21 }
 0x570   : > { %2612 = vrot.lane.b32.xlu1 %v5270_v16, %s6047_s1  ;;  %2432 = vrot.lane.b32.xlu0 %v5266_v27, %s6048_s2 }
 0x571   : > { %v2348_v13 = vpop.f32.mrb[12].mxu0  ;;  %v2419_v53 = vpop.f32.mrb[12].mxu1 }
 0x572   : > { %v2350_v15 = vpop.f32.mrb[13].mxu0  ;;  %v2421_v44 = vpop.f32.mrb[13].mxu1  ;;  %v5342_v29 = vmul.f32 %v2348_v13, %v6055_v41  ;;  %v5358_v52 = vmul.f32 %v2419_v53, %v6057_v38 }
 0x573   : > { %v5378_v61 = vmul.f32 %v2421_v44, %v6058_v22  ;;  %v5394_v28 = vmul.f32 %v2350_v15, %v6060_v34 }
 0x574   : > { %2648 = vrot.lane.b32.xlu1 %v5266_v27, %s6049_s12  ;;  %2436 = vrot.lane.b32.xlu0 %v5270_v16, %s6048_s2  ;;  %6056 = vst [vmem:[#allocation57_spill] sm:$0xff] %v5342_v29 }
 0x575   : > { %6059 = vst [vmem:[#allocation58_spill] sm:$0xff] %v5378_v61  ;;  %6061 = vst [vmem:[#allocation59_spill] sm:$0xff] %v5394_v28 }
 0x578   : > { %2728 = vrot.lane.b32.xlu1 %v5266_v27, %s5993_s0  ;;  %2472 = vrot.lane.b32.xlu0 %v5266_v27, %s6050_s8 }
 0x57c   : > { %2476 = vrot.lane.b32.xlu0 %v5270_v16, %s6050_s8  ;;  %2434 = vrot.lane.b32.xlu1 %v5286_v3, %s6048_s2 }
 0x580   : > { %2512 = vrot.lane.b32.xlu0 %v5266_v27, %s6053_s13  ;;  %2438 = vrot.lane.b32.xlu1 %v5294_v10, %s6048_s2 }
 0x584   : > { %2516 = vrot.lane.b32.xlu0 %v5270_v16, %s6053_s13  ;;  %2474 = vrot.lane.b32.xlu1 %v5286_v3, %s6050_s8 }
 0x588   : > { %2552 = vrot.lane.b32.xlu0 %v5266_v27, %s6054_s16  ;;  %2478 = vrot.lane.b32.xlu1 %v5294_v10, %s6050_s8 }
 0x58c   : > { %2556 = vrot.lane.b32.xlu0 %v5270_v16, %s6054_s16  ;;  %2514 = vrot.lane.b32.xlu1 %v5286_v3, %s6053_s13 }
 0x590   : > { %2608 = vrot.lane.b32.xlu0 %v5266_v27, %s6047_s1  ;;  %2518 = vrot.lane.b32.xlu1 %v5294_v10, %s6053_s13 }
 0x594   : > { %2652 = vrot.lane.b32.xlu0 %v5270_v16, %s6049_s12  ;;  %2554 = vrot.lane.b32.xlu1 %v5286_v3, %s6054_s16 }
 0x598   : > { %2692 = vrot.lane.b32.xlu0 %v5270_v16, %s5991_s15  ;;  %2558 = vrot.lane.b32.xlu1 %v5294_v10, %s6054_s16 }
 0x59c   : > { %2688 = vrot.lane.b32.xlu0 %v5266_v27, %s5991_s15  ;;  %2650 = vrot.lane.b32.xlu1 %v5286_v3, %s6049_s12 }
 0x5a0   : > { %2732 = vrot.lane.b32.xlu0 %v5270_v16, %s5993_s0  ;;  %2654 = vrot.lane.b32.xlu1 %v5294_v10, %s6049_s12 }
 0x5a4   : > { %2610 = vrot.lane.b32.xlu0 %v5286_v3, %s6047_s1  ;;  %2690 = vrot.lane.b32.xlu1 %v5286_v3, %s5991_s15 }
 0x5a8   : > { %2614 = vrot.lane.b32.xlu0 %v5294_v10, %s6047_s1  ;;  %2694 = vrot.lane.b32.xlu1 %v5294_v10, %s5991_s15 }
 0x5ac   : > { %2730 = vrot.lane.b32.xlu1 %v5286_v3, %s5993_s0  ;;  %2656 = vrot.lane.b32.xlu0 %v5342_v29, %s6049_s12 }
 0x5b0   : > { %2734 = vrot.lane.b32.xlu1 %v5294_v10, %s5993_s0  ;;  %2696 = vrot.lane.b32.xlu0 %v5342_v29, %s5991_s15 }
 0x5b4   : > { %2480 = vrot.lane.b32.xlu0 %v5342_v29, %s6050_s8  ;;  %2616 = vrot.lane.b32.xlu1 %v5342_v29, %s6047_s1 }
 0x5b8   : > { %2484 = vrot.lane.b32.xlu0 %v5358_v52, %s6050_s8  ;;  %2440 = vrot.lane.b32.xlu1 %v5342_v29, %s6048_s2 }
 0x5bc   : > { %2736 = vrot.lane.b32.xlu0 %v5342_v29, %s5993_s0  ;;  %2444 = vrot.lane.b32.xlu1 %v5358_v52, %s6048_s2 }
 0x5c0   : > { %2520 = vrot.lane.b32.xlu0 %v5342_v29, %s6053_s13  ;;  %2560 = vrot.lane.b32.xlu1 %v5342_v29, %s6054_s16 }
 0x5c4   : > { %2524 = vrot.lane.b32.xlu0 %v5358_v52, %s6053_s13  ;;  %2564 = vrot.lane.b32.xlu1 %v5358_v52, %s6054_s16 }
 0x5c8   : > { %2446 = vrot.lane.b32.xlu0 %v5378_v61, %s6048_s2  ;;  %2486 = vrot.lane.b32.xlu1 %v5378_v61, %s6050_s8 }
 0x5cc   : > { %2526 = vrot.lane.b32.xlu0 %v5378_v61, %s6053_s13  ;;  %2566 = vrot.lane.b32.xlu1 %v5378_v61, %s6054_s16 }
 0x5d0   : > { %2660 = vrot.lane.b32.xlu0 %v5358_v52, %s6049_s12  ;;  %2620 = vrot.lane.b32.xlu1 %v5358_v52, %s6047_s1 }
 0x5d4   : > { %2700 = vrot.lane.b32.xlu1 %v5358_v52, %s5991_s15  ;;  %2442 = vrot.lane.b32.xlu0 %v5394_v28, %s6048_s2  ;;  %s5842_s2 = scalar_lea.hbm %s5899_s11, %s3278_s25 }
 0x5d8   : > { %2482 = vrot.lane.b32.xlu1 %v5394_v28, %s6050_s8  ;;  %2562 = vrot.lane.b32.xlu0 %v5394_v28, %s6054_s16 }
 0x5dc   : > { %2522 = vrot.lane.b32.xlu1 %v5394_v28, %s6053_s13  ;;  %2618 = vrot.lane.b32.xlu0 %v5394_v28, %s6047_s1 }
 0x5e0   : > { %2658 = vrot.lane.b32.xlu1 %v5394_v28, %s6049_s12  ;;  %2622 = vrot.lane.b32.xlu0 %v5378_v61, %s6047_s1 }
 0x5e2   : > { %v5412_v26 = vpop.permute.xlu1 %2612  ;;  %v5414_v24 = vpop.permute.xlu0 %2432 }
 0x5e4   : > { %2662 = vrot.lane.b32.xlu1 %v5378_v61, %s6049_s12  ;;  %2698 = vrot.lane.b32.xlu0 %v5394_v28, %s5991_s15  ;;  %s3757_s12 = scalar_lea.vmem %s5844_s26, 1024 }
 0x5e5   : > { %p3758_p11 = scmp.ne.s32.totalorder %s5844_s26, %s3757_s12 }
 0x5e6   : > { %v5420_v55 = vpop.permute.xlu1 %2648  ;;  %v2437_v47 = vpop.permute.xlu0 %2436 }
 0x5e7   : > { %p3759_p12 = pnand %p3758_p11, %p3931_p5 }
 0x5e8   : > { %2738 = vrot.lane.b32.xlu1 %v5394_v28, %s5993_s0  ;;  %2702 = vrot.lane.b32.xlu0 %v5378_v61, %s5991_s15 }
 0x5e9   : > { %p3760_p13 = pneg %p3759_p12 }
 0x5ea   : > { %v5426_v50 = vpop.permute.xlu1 %2728  ;;  %v5428_v45 = vpop.permute.xlu0 %2472 }
 0x5ec   : > { %2742 = vrot.lane.b32.xlu1 %v5378_v61, %s5993_s0  ;;  %2740 = vrot.lane.b32.xlu0 %v5358_v52, %s5993_s0  ;;  %v2595_v61 = vmul.f32 %v5294_v10, %v6072_v0 }
 0x5ee   : > { %v2477_v9 = vpop.permute.xlu0 %2476  ;;  %v2435_v13 = vpop.permute.xlu1 %2434 }
 0x5ef   : > { %v2454_v44 = vsel %vm454_vm1, %v5414_v24, %v2435_v13  ;;  %v2453_v8 = vsel %vm454_vm1, %v2435_v13, %v2437_v47 }
 0x5f0   : > { %v2457_v38 = vmul.f32 %v2454_v44, %v4124_v30 }
 0x5f2   : > { %v5434_v53 = vpop.permute.xlu0 %2512  ;;  %v5436_v15 = vpop.permute.xlu1 %2438 }
 0x5f3   : > { %v2452_v20 = vsel %vm454_vm1, %v2437_v47, %v5436_v15 }
 0x5f4   : > { %v2459_v44 = vmul.f32 %v2452_v20, %v4183_v56 }
 0x5f6   : > { %v2517_v12 = vpop.permute.xlu0 %2516  ;;  %v2475_v21 = vpop.permute.xlu1 %2474 }
 0x5f7   : > { %v2494_v41 = vsel %vm536_vm0, %v5428_v45, %v2475_v21  ;;  %v2493_v22 = vsel %vm536_vm0, %v2475_v21, %v2477_v9  ;;  %v2458_v21 = vmul.f32 %v2453_v8, %v4191_v58 }
 0x5f8   : > { %v2497_v34 = vmul.f32 %v2494_v41, %v4128_v31  ;;  %v2498_v4 = vmul.f32 %v2493_v22, %v4195_v59 }
 0x5fa   : > { %v5453_v19 = vpop.permute.xlu0 %2552  ;;  %v2479_v36 = vpop.permute.xlu1 %2478  ;;  %v3625_v51 = vpack.c.bf16 %v2497_v34, %v2457_v38  ;;  %v3643_v13 = vpack.c.bf16 %v2498_v4, %v2458_v21 }
 0x5fb   : > { %v2492_v30 = vsel %vm536_vm0, %v2477_v9, %v2479_v36 }
 0x5fc   : > { %v2499_v31 = vmul.f32 %v2492_v30, %v4187_v57  ;;  %3626 = vmatprep.subr.bf16.mxu0 %v3625_v51  ;;  %v6062_v30 = vld [vmem:[#allocation15_spill] sm:$0xff] }
 0x5fe   : > { %v2557_v41 = vpop.permute.xlu0 %2556  ;;  %v5461_v11 = vpop.permute.xlu1 %2514  ;;  %v3641_v47 = vpack.c.bf16 %v2499_v31, %v2459_v44  ;;  %v6063_v31 = vld [vmem:[#allocation14_spill] sm:$0xff] }
 0x5ff   : > { %v2533_v58 = vsel %vm618_vm2, %v5461_v11, %v2517_v12 }
 0x600   : > { %3642 = vmatprep.subr.bf16.mxu1 %v3641_v47  ;;  %v2538_v21 = vmul.f32 %v2533_v58, %v6063_v31  ;;  %v6066_v31 = vld [vmem:[#allocation22_spill] sm:$0xff] }
 0x601   : > { %3644 = vmatpush1.bf16.msra.mxu1 %v3643_v13 }
 0x602   : > { %v5463_v38 = vpop.permute.xlu0 %2608  ;;  %v5465_v59 = vpop.permute.xlu1 %2518 }
 0x603   : > { %v2532_v57 = vsel %vm618_vm2, %v2517_v12, %v5465_v59 }
 0x604   : > { %v2539_v34 = vmul.f32 %v2532_v57, %v4283_v17  ;;  %v6064_v57 = vld [vmem:[#allocation17_spill] sm:$0xff] }
 0x606   : > { %v5467_v22 = vpop.permute.xlu0 %2652  ;;  %v5469_v9 = vpop.permute.xlu1 %2554 }
 0x607   : > { %v2573_v56 = vsel %vm700_vm3, %v5469_v9, %v2557_v41 }
 0x608   : > { %v2578_v8 = vmul.f32 %v2573_v56, %v4287_v18 }
 0x60a   : > { %v5480_v4 = vpop.permute.xlu0 %2692  ;;  %v5482_v51 = vpop.permute.xlu1 %2558  ;;  %v3647_v5 = vpack.c.bf16 %v2578_v8, %v2538_v21  ;;  %v2594_v21 = vmul.f32 %v5270_v16, %v6066_v31  ;;  %v6070_v31 = vld [vmem:[#allocation30_spill] sm:$0xff] }
 0x60b   : > { %v2572_v20 = vsel %vm700_vm3, %v2557_v41, %v5482_v51 }
 0x60c   : > { %v2579_v44 = vmul.f32 %v2572_v20, %v6062_v30  ;;  %v6065_v20 = vld [vmem:[#allocation16_spill] sm:$0xff] }
 0x60d   : > { %v5510_v8 = vmul.f32 %v5286_v3, %v6065_v20 }
 0x60e   : > { %v5491_v47 = vpop.permute.xlu0 %2688  ;;  %v5493_v13 = vpop.permute.xlu1 %2650  ;;  %v3645_v12 = vpack.c.bf16 %v2579_v44, %v2539_v34 }
 0x610   : > { %3646 = vmatprep.subr.bf16.mxu1 %v3645_v12  ;;  %v6067_v12 = vld [vmem:[#allocation21_spill] sm:$0xff] }
 0x611   : > { %3648 = vmatpush1.bf16.msra.mxu1 %v3647_v5 }
 0x612   : > { %v5495_v54 = vpop.permute.xlu0 %2732  ;;  %v2655_v18 = vpop.permute.xlu1 %2654 }
 0x616   : > { %v5497_v56 = vpop.permute.xlu0 %2610  ;;  %v5499_v41 = vpop.permute.xlu1 %2690 }
 0x617   : > { %v2629_v17 = vsel %vm839_vm4, %v5497_v56, %v5412_v26 }
 0x618   : > { %v5506_v58 = vmul.f32 %v2629_v17, %v6064_v57 }
 0x61a   : > { %v2615_v5 = vpop.permute.xlu0 %2614  ;;  %v2695_v34 = vpop.permute.xlu1 %2694 }
 0x61b   : > { %v2628_v44 = vsel %vm839_vm4, %v5412_v26, %v2615_v5 }
 0x61c   : > { %v2634_v35 = vmul.f32 %v2628_v44, %v6067_v12  ;;  %v2708_v44 = vsel %vm1003_vm6, %v5480_v4, %v2695_v34  ;;  %v6071_v12 = vld [vmem:[#allocation23_spill] sm:$0xff] }
 0x61e   : > { %v3651_v17 = vpack.c.bf16 %v2634_v35, %v2594_v21  ;;  %v5520_v57 = vpop.permute.xlu1 %2730  ;;  %v5522_v29 = vpop.permute.xlu0 %2656 }
 0x61f   : > { %6068 = vst [vmem:[#allocation15_spill] sm:$0xff] %v5522_v29  ;;  %v2667_v16 = vsel %vm921_vm5, %v2655_v18, %v5522_v29  ;;  %v2668_v29 = vsel %vm921_vm5, %v5467_v22, %v2655_v18 }
 0x622   : > { %v2735_v3 = vpop.permute.xlu1 %2734  ;;  %v5524_v20 = vpop.permute.xlu0 %2696 }
 0x623   : > { %6069 = vst [vmem:[#allocation14_spill] sm:$0xff] %v5524_v20  ;;  %v2707_v30 = vsel %vm1003_vm6, %v2695_v34, %v5524_v20 }
 0x624   : > { %v2715_v21 = vmul.f32 %v2707_v30, %v6070_v31  ;;  %v6074_v31 = vld [vmem:[#allocation28_spill] sm:$0xff] }
 0x626   : > { %v5529_v39 = vpop.permute.xlu0 %2480  ;;  %v5531_v26 = vpop.permute.xlu1 %2616 }
 0x627   : > { %v2627_v35 = vsel %vm839_vm4, %v2615_v5, %v5531_v26  ;;  %v2491_v62 = vsel %vm536_vm0, %v2479_v36, %v5529_v39  ;;  %v6073_v5 = vld [vmem:[#allocation29_spill] sm:$0xff] }
 0x628   : > { %v2635_v20 = vmul.f32 %v2627_v35, %v6071_v12  ;;  %v2675_v28 = vmul.f32 %v2667_v16, %v6073_v5  ;;  %v2714_v35 = vmul.f32 %v2708_v44, %v6074_v31  ;;  %v5563_v36 = vmul.f32 %v2491_v62, %v4527_v1  ;;  %v6075_v16 = vld [vmem:[#allocation31_spill] sm:$0xff]  ;;  %v5598_v31 = vld [vmem:[%s5895_s7] sm:$0xff] }
 0x629   : > { %v2674_v12 = vmul.f32 %v2668_v29, %v6075_v16  ;;  %v6077_v62 = vld [vmem:[#allocation35_spill] sm:$0xff] }
 0x62a   : > { %v5553_v33 = vpop.permute.xlu0 %2484  ;;  %v5555_v34 = vpop.permute.xlu1 %2440  ;;  %v3649_v30 = vpack.c.bf16 %v2635_v20, %v2595_v61  ;;  %v3653_v18 = vpack.c.bf16 %v2715_v21, %v2675_v28  ;;  %v6078_v21 = vld [vmem:[#allocation34_spill] sm:$0xff] }
 0x62b   : > { %v2451_v0 = vsel %vm454_vm1, %v5436_v15, %v5555_v34  ;;  %v3655_v15 = vpack.c.bf16 %v2714_v35, %v2674_v12 }
 0x62c   : > { %v5566_v10 = vmul.f32 %v2451_v0, %v4519_v43  ;;  %3650 = vmatprep.subr.bf16.mxu1 %v3649_v30  ;;  %v2748_v43 = vsel %vm1085_vm7, %v5495_v54, %v2735_v3 }
 0x62d   : > { %3652 = vmatpush1.bf16.msra.mxu1 %v3651_v17  ;;  %v2754_v5 = vmul.f32 %v2748_v43, %v6078_v21 }
 0x62e   : > { %v5571_v20 = vpop.permute.xlu0 %2736  ;;  %3654 = vmatprep.subr.bf16.mxu1 %v3653_v18  ;;  %v5573_v44 = vpop.permute.xlu1 %2444 }
 0x62f   : > { %6076 = vst [vmem:[#allocation17_spill] sm:$0xff] %v5571_v20  ;;  %v2747_v1 = vsel %vm1085_vm7, %v2735_v3, %v5571_v20 }
 0x630   : > { %v2755_v29 = vmul.f32 %v2747_v1, %v6077_v62 }
 0x631   : > { %3656 = vmatpush1.bf16.msra.mxu1 %v3655_v15 }
 0x632   : > { %v5582_v28 = vpop.permute.xlu0 %2520  ;;  %2931 = vmatprep.subr.mxu1 %v2755_v29  ;;  %v5584_v17 = vpop.permute.xlu1 %2560  ;;  %v6081_v29 = vld [vmem:[#allocation8_spill] sm:$0xff] }
 0x633   : > { %v2531_v30 = vsel %vm618_vm2, %v5465_v59, %v5582_v28  ;;  %v2571_v3 = vsel %vm700_vm3, %v5482_v51, %v5584_v17  ;;  %v6080_v51 = vld [vmem:[#allocation11_spill] sm:$0xff] }
 0x634   : > { %v5601_v35 = vmul.f32 %v2531_v30, %v4582_v42  ;;  %v5604_v0 = vmul.f32 %v2571_v3, %v4590_v14  ;;  %v2574_v42 = vsel %vm700_vm3, %v5453_v19, %v5469_v9  ;;  %v2534_v14 = vsel %vm618_vm2, %v5434_v53, %v5461_v11  ;;  %v6082_v30 = vld [vmem:[#allocation9_spill] sm:$0xff] }
 0x635   : > { %2932 = vmatpush1.msra.mxu1 %v2754_v5  ;;  %v2577_v12 = vmul.f32 %v2574_v42, %v6080_v51  ;;  %v6083_v51 = vld [vmem:[#allocation10_spill] sm:$0xff] }
 0x636   : > { %6079 = vst [vmem:[#allocation16_spill] sm:$0xff] %v5601_v35  ;;  %v5608_v18 = vpop.permute.xlu0 %2524  ;;  %v5610_v16 = vpop.permute.xlu1 %2564  ;;  %3269 = vmatmul.mubr.msk.f32.vlgmr.msra.gmra.mrb[14].mxu1 %vm1230_vm8, %v5598_v31  ;;  %v2537_v59 = vmul.f32 %v2534_v14, %v6083_v51  ;;  %v2630_v35 = vsel %vm839_vm4, %v5463_v38, %v5497_v56  ;;  %v2709_v14 = vsel %vm1003_vm6, %v5499_v41, %v5480_v4  ;;  %v6086_v56 = vld [vmem:[#allocation19_spill] sm:$0xff] }
 0x637   : > { %3121 = vmatprep.mubr.f32.mxu1 %v6023_v60  ;;  %v2710_v4 = vsel %vm1003_vm6, %v5491_v47, %v5499_v41 }
 0x63a   : > { %v2447_v15 = vpop.permute.xlu0 %2446  ;;  %v2487_v1 = vpop.permute.xlu1 %2486 }
 0x63b   : > { %v2448_v43 = vsel %vm454_vm1, %v5573_v44, %v2447_v15  ;;  %v2455_v62 = vsel %vm454_vm1, %v2447_v15, %v5414_v24  ;;  %v2488_v9 = vsel %vm536_vm0, %v5553_v33, %v2487_v1  ;;  %v2495_v11 = vsel %vm536_vm0, %v2487_v1, %v5428_v45  ;;  %v6084_v1 = vld [vmem:[#allocation13_spill] sm:$0xff] }
 0x63c   : > { %v2456_v21 = vmul.f32 %v2455_v62, %v6081_v29  ;;  %v2463_v5 = vmul.f32 %v2448_v43, %v4560_v40  ;;  %v2496_v3 = vmul.f32 %v2495_v11, %v6082_v30  ;;  %v2503_v42 = vmul.f32 %v2488_v9, %v4547_v32  ;;  %v6085_v62 = vld [vmem:[#allocation12_spill] sm:$0xff]  ;;  %v6088_v29 = vld [vmem:[#allocation18_spill] sm:$0xff] }
 0x63d   : > { %v3629_v32 = vpack.c.bf16 %v2577_v12, %v2537_v59  ;;  %v6090_v30 = vpack.c.bf16 %v5506_v58, %v5510_v8 }
 0x63e   : > { %v3627_v61 = vpack.c.bf16 %v2496_v3, %v2456_v21  ;;  %v2527_v24 = vpop.permute.xlu0 %2526  ;;  %v2567_v15 = vpop.permute.xlu1 %2566  ;;  %v3673_v20 = vpack.c.bf16 %v2503_v42, %v2463_v5  ;;  %v2592_v21 = vmul.f32 %v5266_v27, %v6088_v29  ;;  %v6091_v42 = vld [vmem:[#allocation27_spill] sm:$0xff]  ;;  %v2749_v27 = vsel %vm1085_vm7, %v5520_v57, %v5495_v54 }
 0x63f   : > { %v2535_v45 = vsel %vm618_vm2, %v2527_v24, %v5434_v53  ;;  %v2575_v40 = vsel %vm700_vm3, %v2567_v15, %v5453_v19  ;;  %v2669_v53 = vsel %vm921_vm5, %v5493_v13, %v5467_v22  ;;  %v2632_v19 = vmul.f32 %v2630_v35, %v6086_v56  ;;  %v6089_v35 = vld [vmem:[#allocation24_spill] sm:$0xff] }
 0x640   : > { %v2536_v43 = vmul.f32 %v2535_v45, %v6084_v1  ;;  %v2576_v9 = vmul.f32 %v2575_v40, %v6085_v62  ;;  %3628 = vmatpush1.bf16.msra.mxu0 %v3627_v61  ;;  %3674 = vmatprep.subr.bf16.mxu1 %v3673_v20  ;;  %v6087_v61 = vld [vmem:[#allocation25_spill] sm:$0xff]  ;;  %v2670_v22 = vsel %vm921_vm5, %v5420_v55, %v5493_v13 }
 0x641   : > { %3630 = vmatprep.subr.bf16.mxu0 %v3629_v32  ;;  %v2713_v20 = vmul.f32 %v2709_v14, %v6087_v61  ;;  %v2673_v5 = vmul.f32 %v2669_v53, %v6089_v35  ;;  %v3635_v3 = vpack.c.bf16 %v2632_v19, %v2592_v21  ;;  %v2712_v41 = vmul.f32 %v2710_v4, %v6091_v42  ;;  %v6092_v32 = vld [vmem:[#allocation26_spill] sm:$0xff]  ;;  %v6095_v4 = vld [vmem:[#allocation36_spill] sm:$0xff] }
 0x642   : > { %v3631_v59 = vpack.c.bf16 %v2576_v9, %v2536_v43  ;;  %v5662_v12 = vpop.permute.xlu0 %2660  ;;  %v5664_v11 = vpop.permute.xlu1 %2620  ;;  %v2672_v13 = vmul.f32 %v2670_v22, %v6092_v32  ;;  %v2528_v14 = vsel %vm618_vm2, %v5608_v18, %v2527_v24  ;;  %v2568_v58 = vsel %vm700_vm3, %v5610_v16, %v2567_v15  ;;  %v6093_v43 = vld [vmem:[#allocation33_spill] sm:$0xff] }
 0x643   : > { %v3637_v40 = vpack.c.bf16 %v2713_v20, %v2673_v5  ;;  %v2750_v24 = vsel %vm1085_vm7, %v5426_v50, %v5520_v57  ;;  %v2753_v62 = vmul.f32 %v2749_v27, %v6093_v43  ;;  %v2543_v53 = vmul.f32 %v2528_v14, %v4620_v37  ;;  %v6096_v20 = vld [vmem:[#allocation37_spill] sm:$0xff]  ;;  %v6104_v43 = vld [vmem:[#allocation58_spill] sm:$0xff] }
 0x644   : > { %3632 = vmatpush1.bf16.msra.mxu0 %v3631_v59  ;;  %v3639_v1 = vpack.c.bf16 %v2712_v41, %v2672_v13  ;;  %v2583_v56 = vmul.f32 %v2568_v58, %v4607_v2  ;;  %v6094_v59 = vld [vmem:[#allocation38_spill] sm:$0xff]  ;;  %v2598_v58 = vmul.f32 %v5358_v52, %v4662_v6  ;;  %v6105_v6 = vld [vmem:[#allocation43_spill] sm:$0xff] }
 0x645   : > { %3634 = vmatprep.subr.bf16.mxu0 %v6090_v30 }
 0x646   : > { %v5682_v51 = vpop.permute.xlu1 %2700  ;;  %v2443_v45 = vpop.permute.xlu0 %2442 }
 0x647   : > { %v2449_v8 = vsel %vm454_vm1, %v2443_v45, %v5573_v44  ;;  %v2450_v54 = vsel %vm454_vm1, %v5555_v34, %v2443_v45  ;;  %v6099_v45 = vld [vmem:[#allocation39_spill] sm:$0xff] }
 0x648   : > { %3636 = vmatpush1.bf16.msra.mxu0 %v3635_v3  ;;  %v2461_v19 = vmul.f32 %v2450_v54, %v4523_v49  ;;  %v2462_v57 = vmul.f32 %v2449_v8, %v6094_v59  ;;  %v6098_v3 = vld [vmem:[#allocation40_spill] sm:$0xff] }
 0x649   : > { %3638 = vmatprep.subr.bf16.mxu0 %v3637_v40 }
 0x64a   : > { %v2483_v9 = vpop.permute.xlu1 %2482  ;;  %v2563_v15 = vpop.permute.xlu0 %2562 }
 0x64b   : > { %v2489_v44 = vsel %vm536_vm0, %v2483_v9, %v5553_v33  ;;  %v2490_v34 = vsel %vm536_vm0, %v5529_v39, %v2483_v9  ;;  %v2569_v2 = vsel %vm700_vm3, %v2563_v15, %v5610_v16  ;;  %v2570_v37 = vsel %vm700_vm3, %v5584_v17, %v2563_v15  ;;  %v6097_v33 = vld [vmem:[#allocation32_spill] sm:$0xff] }
 0x64c   : > { %v2501_v61 = vmul.f32 %v2490_v34, %v6095_v4  ;;  %v2502_v29 = vmul.f32 %v2489_v44, %v6096_v20  ;;  %3640 = vmatpush1.bf16.msra.mxu0 %v3639_v1  ;;  %v2752_v39 = vmul.f32 %v2750_v24, %v6097_v33  ;;  %v3677_v17 = vpack.c.bf16 %v2583_v56, %v2543_v53  ;;  %v6101_v1 = vld [vmem:[#allocation42_spill] sm:$0xff]  ;;  %v6102_v24 = vld [vmem:[#allocation59_spill] sm:$0xff]  ;;  %v6106_v53 = vld [vmem:[#allocation41_spill] sm:$0xff] }
 0x64d   : > { %2860 = vmatprep.subr.mxu0 %v2753_v62  ;;  %v2581_v42 = vmul.f32 %v2570_v37, %v6098_v3  ;;  %v2582_v41 = vmul.f32 %v2569_v2, %v4603_v46  ;;  %v6107_v56 = vld [vmem:[#allocation57_spill] sm:$0xff]  ;;  %v6108_v34 = vld [vmem:[#allocation16_spill] sm:$0xff]  ;;  %v6111_v4 = vld [vmem:[#allocation15_spill] sm:$0xff] }
 0x64e   : > { %v3675_v21 = vpack.c.bf16 %v2502_v29, %v2462_v57  ;;  %v2523_v49 = vpop.permute.xlu1 %2522  ;;  %v2619_v22 = vpop.permute.xlu0 %2618  ;;  %v3657_v35 = vpack.c.bf16 %v2501_v61, %v2461_v19  ;;  %v2596_v44 = vmul.f32 %v6107_v56, %v6106_v53  ;;  %v6109_v19 = vpack.c.bf16 %v5604_v0, %v6108_v34  ;;  %v6110_v57 = vld [vmem:[#allocation14_spill] sm:$0xff]  ;;  %v6113_v2 = vld [vmem:[#allocation47_spill] sm:$0xff]  ;;  %v6116_v3 = vld [vmem:[#allocation49_spill] sm:$0xff] }
 0x64f   : > { %v2529_v5 = vsel %vm618_vm2, %v2523_v49, %v5608_v18  ;;  %v2530_v30 = vsel %vm618_vm2, %v5582_v28, %v2523_v49  ;;  %v2625_v16 = vsel %vm839_vm4, %v2619_v22, %v5664_v11  ;;  %v2626_v18 = vsel %vm839_vm4, %v5531_v26, %v2619_v22  ;;  %v6112_v20 = vld [vmem:[#allocation46_spill] sm:$0xff]  ;;  %v3751_v53 = vld [vmem:[%s3946_s14] sm:$0xff] }
 0x650   : > { %v2541_v27 = vmul.f32 %v2530_v30, %v6099_v45  ;;  %v2542_v40 = vmul.f32 %v2529_v5, %v4616_v63  ;;  %2861 = vmatpush1.msra.mxu0 %v2752_v39  ;;  %3676 = vmatpush1.bf16.msra.mxu1 %v3675_v21  ;;  %v2637_v32 = vmul.f32 %v2625_v16, %v4640_v25  ;;  %v6114_v21 = vld [vmem:[#allocation45_spill] sm:$0xff]  ;;  %v6115_v30 = vld [vmem:[#allocation48_spill] sm:$0xff]  ;;  %v6118_v45 = vld [vmem:[#allocation51_spill] sm:$0xff] }
 0x651   : > { %3658 = vmatprep.subr.bf16.mxu0 %v3657_v35  ;;  %3678 = vmatprep.subr.bf16.mxu1 %v3677_v17  ;;  %v6100_v63 = vpack.c.bf16 %v5563_v36, %v5566_v10  ;;  %v2597_v36 = vmul.f32 %v6102_v24, %v6101_v1  ;;  %v6103_v10 = vld [vmem:[#allocation44_spill] sm:$0xff]  ;;  %v2636_v52 = vmul.f32 %v2626_v18, %v6105_v6  ;;  %v6123_v24 = vld [vmem:[#allocation55_spill] sm:$0xff] }
 0x652   : > { %v3679_v28 = vpack.c.bf16 %v2582_v41, %v2542_v40  ;;  %3268 = vmatmul.mubr.msk.f32.vlgmr.msra.gmra.mrb[14].mxu0 %vm1230_vm8, %v5598_v31  ;;  %v2659_v13 = vpop.permute.xlu1 %2658  ;;  %v2623_v46 = vpop.permute.xlu0 %2622  ;;  %v3661_v14 = vpack.c.bf16 %v2581_v42, %v2541_v27  ;;  %v2599_v62 = vmul.f32 %v6104_v43, %v6103_v10  ;;  %v6117_v42 = vld [vmem:[#allocation50_spill] sm:$0xff]  ;;  %v6119_v40 = vld [vmem:[#allocation52_spill] sm:$0xff] }
 0x653   : > { %3660 = vmatpush1.bf16.msra.mxu0 %v6100_v63  ;;  %v2624_v26 = vsel %vm839_vm4, %v5664_v11, %v2623_v46  ;;  %v2631_v25 = vsel %vm839_vm4, %v2623_v46, %v5463_v38  ;;  %v2665_v11 = vsel %vm921_vm5, %v2659_v13, %v5662_v12  ;;  %3050 = vmatprep.mubr.f32.mxu0 %v6023_v60 }
 0x654   : > { %v2638_v8 = vmul.f32 %v2624_v26, %v4677_v48  ;;  %v2639_v54 = vmul.f32 %v2631_v25, %v4681_v7  ;;  %3662 = vmatprep.subr.bf16.mxu0 %v3661_v14  ;;  %3680 = vmatpush1.bf16.msra.mxu1 %v3679_v28  ;;  %v3665_v7 = vpack.c.bf16 %v2637_v32, %v2597_v36  ;;  %v6120_v32 = vld [vmem:[#allocation17_spill] sm:$0xff] }
 0x655   : > { %v2666_v61 = vsel %vm921_vm5, %v6111_v4, %v2659_v13  ;;  %v2677_v29 = vmul.f32 %v2665_v11, %v6112_v20  ;;  %v3667_v33 = vpack.c.bf16 %v2636_v52, %v2596_v44  ;;  %v6121_v26 = vld [vmem:[#allocation53_spill] sm:$0xff]  ;;  %v3749_v52 = vld [vmem:[%s3946_s14 + $0x10] sm:$0xff] }
 0x656   : > { %v3683_v38 = vpack.c.bf16 %v2638_v8, %v2598_v58  ;;  %v2663_v48 = vpop.permute.xlu1 %2662  ;;  %v2699_v9 = vpop.permute.xlu0 %2698  ;;  %v3681_v15 = vpack.c.bf16 %v2639_v54, %v2599_v62  ;;  %v2676_v16 = vmul.f32 %v2666_v61, %v6115_v30  ;;  %v6122_v54 = vld [vmem:[#allocation54_spill] sm:$0xff]  ;;  %v3752_v44 = vld [vmem:[%s3946_s14 + $0x8] sm:$0xff]  ;;  %v3753_v61 = vld [vmem:[%s3946_s14 + $0x20] sm:$0xff] }
 0x657   : > { %3664 = vmatpush1.bf16.msra.mxu0 %v6109_v19  ;;  %v2705_v59 = vsel %vm1003_vm6, %v2699_v9, %v5682_v51  ;;  %v2706_v60 = vsel %vm1003_vm6, %v6110_v57, %v2699_v9  ;;  %v2664_v0 = vsel %vm921_vm5, %v5662_v12, %v2663_v48  ;;  %v2671_v39 = vsel %vm921_vm5, %v2663_v48, %v5420_v55 }
 0x658   : > { %v2717_v37 = vmul.f32 %v2705_v59, %v6113_v2  ;;  %3666 = vmatprep.subr.bf16.mxu0 %v3665_v7  ;;  %v2716_v49 = vmul.f32 %v2706_v60, %v6114_v21  ;;  %3682 = vmatprep.subr.bf16.mxu1 %v3681_v15  ;;  %v2678_v55 = vmul.f32 %v2664_v0, %v6116_v3 }
 0x659   : > { %3684 = vmatpush1.bf16.msra.mxu1 %v3683_v38  ;;  %v2679_v41 = vmul.f32 %v2671_v39, %v6117_v42  ;;  %v3750_v38 = vld [vmem:[%s3946_s14 + $0x18] sm:$0xff]  ;;  %v3755_v39 = vld [vmem:[%s3946_s14 + $0x30] sm:$0xff] }
 0x65a   : > { %v2739_v22 = vpop.permute.xlu1 %2738  ;;  %v2703_v35 = vpop.permute.xlu0 %2702  ;;  %v3669_v5 = vpack.c.bf16 %v2717_v37, %v2677_v29  ;;  %v3671_v28 = vpack.c.bf16 %v2716_v49, %v2676_v16  ;;  %v3754_v37 = vld [vmem:[%s3946_s14 + $0x28] sm:$0xff]  ;;  %v3756_v49 = vld [vmem:[%s3946_s14 + $0x38] sm:$0xff]  ;;  %s3832_s14 = smov [#allocation4]  }
 0x65b   : > { %v2704_v17 = vsel %vm1003_vm6, %v5682_v51, %v2703_v35  ;;  %v2711_v12 = vsel %vm1003_vm6, %v2703_v35, %v5491_v47  ;;  %3668 = vmatpush1.bf16.msra.mxu0 %v3667_v33  ;;  %v2746_v13 = vsel %vm1085_vm7, %v6120_v32, %v2739_v22  ;;  %s3761_s8 = sshll.u32 %s3832_s14, 4  ;;  %s3762_s8 = int_to_ptr.vmem [resolvable:$false] %s3761_s8 }
 0x65c   : > { %v2718_v27 = vmul.f32 %v2704_v17, %v6118_v45  ;;  %v2719_v18 = vmul.f32 %v2711_v12, %v6119_v40  ;;  %3670 = vmatprep.subr.bf16.mxu0 %v3669_v5  ;;  %v2756_v36 = vmul.f32 %v2746_v13, %v6123_v24  ;;  %s3763_s13 = scalar_lea.vmem %s3762_s8, 2048  ;;  %p3764_p0 = scmp.lt.s32.totalorder %s5844_s26, %s3762_s8 }
 0x65d   : > { %p3765_p1 = scmp.lt.s32.totalorder %s3763_s13, %s3757_s12 }
 0x65e   : > { %v3687_v51 = vpack.c.bf16 %v2718_v27, %v2678_v55  ;;  %v2743_v46 = vpop.permute.xlu1 %2742  ;;  %v2741_v14 = vpop.permute.xlu0 %2740  ;;  %v3685_v63 = vpack.c.bf16 %v2719_v18, %v2679_v41 }
 0x65f   : > { %v2751_v47 = vsel %vm1085_vm7, %v2743_v46, %v5426_v50  ;;  %v2745_v58 = vsel %vm1085_vm7, %v2739_v22, %v2741_v14  ;;  %3672 = vmatpush1.bf16.msra.mxu0 %v3671_v28  ;;  %v2744_v8 = vsel %vm1085_vm7, %v2741_v14, %v2743_v46  ;;  %v6124_v50 = vld [vmem:[#allocation56_spill] sm:$0xff]  ;;  %p3766_p2 = por %p3765_p1, %p3764_p0 }
 0x660   : > { %v2759_v25 = vmul.f32 %v2751_v47, %v6121_v26  ;;  %v2757_v1 = vmul.f32 %v2745_v58, %v6122_v54  ;;  %3686 = vmatprep.subr.bf16.mxu1 %v3685_v63  ;;  %v2758_v10 = vmul.f32 %v2744_v8, %v6124_v50 }
 0x661   : > { %3688 = vmatpush1.bf16.msra.mxu1 %v3687_v51  ;;  %p3767_p3 = pnand %p3766_p2, %p3760_p13 }
 0x662   : > { %3002 = vmatprep.subr.mxu0 %v2757_v1  ;;  %3073 = vmatprep.subr.mxu1 %v2759_v25 }
 0x663   : > { %3003 = vmatpush1.msra.mxu0 %v2756_v36 }
 0x664   : > { %3270 = vmatmul.mubr.msk.f32.vlgmr.msra.gmra.mrb[16].mxu0 %vm1230_vm8, %v5598_v31 }
 0x665   : > { %3074 = vmatpush1.msra.mxu1 %v2758_v10 }
 0x666   : > { %3271 = vmatmul.mubr.msk.f32.vlgmr.msra.gmra.mrb[16].mxu1 %vm1230_vm8, %v5598_v31 }
 0x709   : > { %v2981_v23 = vpop.f32.mrb[14].mxu1 }
 0x70a   : > { %v3130_v43 = vmul.f32 1.6, %v2981_v23  ;;  %v2983_v62 = vpop.f32.mrb[15].mxu1 }
 0x70b   : > { %v3131_v6 = vmul.f32 1.6, %v2983_v62 }
 0x70c   : > { %v3138_v11 = vadd.f32 %v3749_v52, %v3130_v43 }
 0x70d   : > { %v3139_v48 = vadd.f32 %v3750_v38, %v3131_v6 }
 0x70e   : > { %3146 = vst [vmem:[%s5823_s30 + $0x10] sm:$0xff] %v3138_v11 }
 0x70f   : > { %3147 = vst [vmem:[%s5823_s30 + $0x18] sm:$0xff] %v3139_v48 }
 0x725   : > { %v2910_v31 = vpop.f32.mrb[14].mxu0 }
 0x726   : > { %v3128_v9 = vmul.f32 1.6, %v2910_v31  ;;  %v2912_v7 = vpop.f32.mrb[15].mxu0 }
 0x727   : > { %v3129_v15 = vmul.f32 1.6, %v2912_v7 }
 0x728   : > { %v3136_v56 = vadd.f32 %v3751_v53, %v3128_v9 }
 0x729   : > { %v3137_v34 = vadd.f32 %v3752_v44, %v3129_v15 }
 0x72a   : > { %3144 = vst [vmem:[%s5823_s30] sm:$0xff] %v3136_v56 }
 0x72b   : > { %3145 = vst [vmem:[%s5823_s30 + $0x8] sm:$0xff] %v3137_v34 }
 0x737   : > { %v3052_v19 = vpop.f32.mrb[16].mxu0 }
 0x738   : > { %v3132_v59 = vmul.f32 1.6, %v3052_v19  ;;  %v3054_v57 = vpop.f32.mrb[17].mxu0 }
 0x739   : > { %v3123_v60 = vpop.f32.mrb[16].mxu1  ;;  %v3133_v4 = vmul.f32 1.6, %v3054_v57 }
 0x73a   : > { %v3140_v20 = vadd.f32 %v3753_v61, %v3132_v59  ;;  %v3134_v29 = vmul.f32 1.6, %v3123_v60  ;;  %v3125_v2 = vpop.f32.mrb[17].mxu1 }
 0x73b   : > { %v3141_v33 = vadd.f32 %v3754_v37, %v3133_v4  ;;  %v3135_v0 = vmul.f32 1.6, %v3125_v2 }
 0x73c   : > { %3148 = vst [vmem:[%s5823_s30 + $0x20] sm:$0xff] %v3140_v20  ;;  %v3142_v21 = vadd.f32 %v3755_v39, %v3134_v29 }
 0x73d   : > { %3149 = vst [vmem:[%s5823_s30 + $0x28] sm:$0xff] %v3141_v33  ;;  %v3143_v22 = vadd.f32 %v3756_v49, %v3135_v0 }
 0x73e   : > { %3150 = vst [vmem:[%s5823_s30 + $0x30] sm:$0xff] %v3142_v21 }
 0x73f   : > { %3151 = vst [vmem:[%s5823_s30 + $0x38] sm:$0xff] %v3143_v22 }
 0x740   : > { %3770 = shalt.err (!%p3767_p3)
}
 0x741   : > { %s3771_s16 = scalar_lea.hbm %s5842_s2, 1024  ;;  %s3775_s22 = scalar_lea.hbm %s5899_s11, 2048 }
 0x742   : > { %p3772_p4 = scmp.ne.s32.totalorder %s5842_s2, %s3771_s16  ;;  %p3776_p9 = scmp.lt.u32.totalorder %s5842_s2, %s5899_s11 }
 0x743   : > { %p3777_p10 = scmp.lt.u32.totalorder %s3775_s22, %s3771_s16  ;;  %p3779_p12 = scmp.lt.u32.totalorder %s3771_s16, %s5842_s2 }
 0x744   : > { %p3773_p7 = pnand %p3772_p4, %p3931_p5 }
 0x745   : > { %p3778_p11 = por %p3777_p10, %p3776_p9 }
 0x746   : > { %p3774_p8 = pneg %p3773_p7 }
 0x747   : > { %p3780_p13 = por %p3779_p12, %p3778_p11 }
 0x749   : > { %p3781_p0 = pnand %p3780_p13, %p3774_p8 }
 0x74b   : > { %3784 = shalt.err (!%p3781_p0)
}
 0x74c   : > { %3689 = dma.vmem_to_hbm [thread:$0]  (%p3931_p5), %s5844_s26, 1024, %s5842_s2, %s3153_s21  }
 0x74d PF: > { %p3695_p1 = scmp.ge.s32.totalorder %s3819_s20, 2  ;;  %s3179_s25 = sand.u32 1, %s3807_s17  }
 0x74e   : > { %s3180_s29 = scalar_lea.sflag [#allocation5], %s3179_s25 }
 0x74f   : > { %p3692_p2 = pnand %p3695_p1, %p3935_p6 }
 0x751   : > { %3802 = dma.done.wait (!%p3692_p2), %s3180_s29, 1024  }
 0x752   : > { %3804 = vsyncadd (!%p3692_p2), %s3180_s29, 4294966272  ;;  %s6125_s1 = sld [smem:[#allocation7_spill]]  ;;  %p21_p3 = scmp.ge.s32.totalorder %s3918_s23, 4  }
 0x753   : > { %s6126_s17 = smov %s3811_s18  ;;  %s6127_s18 = smov %s3815_s19 }
 0x754   : > { %s6129_s20 = smov %s3918_s23  ;;  %23 = sbr.rel (!%p21_p3) target bundleno = 8 (0x8), region = 107 }
 0x758   : > { %s6128_s19 = smov %s6125_s1 }
 0x75b   :  { %3185 = vsyncpa [#allocation5], 1 }
 0x75c   :  { %3187 = vsyncpa [#allocation5 + $0x1], 1 }

</bundles_post_ra>
